<compile_context>
chip_gen: v5e
topology: v5e:2x2
jax: 0.10.0
libtpu: 0.0.40
codegen_flags: <defaults>
</compile_context>

<pallas_src>
import functools

import jax
import jax.numpy as jnp
import numpy as np
from jax import lax
from jax.experimental import pallas as pl
from jax.experimental.pallas import tpu as pltpu

LANE = 128
NEG_MASK = -1.0e11  # same sentinel as the PyTorch module


def _round_up(v, m):
    return (v + m - 1) // m * m


def _make_dqn_kernel(n_layers: int):
    """Kernel closed over the (static) number of hidden layers."""

    def kernel(x_ref, off_ref, *rest):
        # rest = [w0, b0, ..., w_out, b_out, out_ref]
        out_ref = rest[-1]
        params = rest[:-1]

        h = x_ref[...]                                    # (TB, D) bf16 (streamed)
        k = 0
        for _ in range(n_layers):
            w = params[k][...]                            # (in, Hp) bf16
            b = params[k + 1][...]                        # (1, Hp)  f32
            k += 2
            # bf16 MXU matmul, f32 accumulation; bias/ReLU stay f32 on the VPU.
            a = jnp.dot(h, w, preferred_element_type=jnp.float32) + b
            h = jnp.maximum(a, 0.0).astype(jnp.bfloat16)  # ReLU, re-pack for next MXU op

        w_out = params[k][...]                            # (Hp, Ap) bf16
        b_out = params[k + 1][...]                        # (1, Ap)  f32
        q = jnp.dot(h, w_out, preferred_element_type=jnp.float32) + b_out  # (TB, Ap)

        # Lane-dense epilogue: transpose so the batch lives on the lane axis and
        # all reductions produce a (1, TB) row that stores densely.
        qt = jnp.transpose(q)                             # (Ap, TB) f32 (vxpose)
        Ap, TB = qt.shape
        row = lax.broadcasted_iota(jnp.int32, (Ap, TB), 0)  # action index along sublanes
        off = off_ref[...]                                # (1, TB) i32 valid-action counts

        # select_valid_outputs: actions >= offset (incl. padded actions) get -1e11.
        qt = jnp.where(row >= off, jnp.float32(NEG_MASK), qt)

        # argmax along the action axis (first max index): max + masked-min-index.
        # NOTE: exact float compare diverges from argmax only if q has NaNs.
        m = jnp.max(qt, axis=0, keepdims=True)            # (1, TB)
        cand = jnp.where(qt == m, row, jnp.int32(Ap))
        out_ref[...] = jnp.min(cand, axis=0, keepdims=True).astype(jnp.int32)  # (1, TB)

    return kernel


def prepare_params(params_f32, lane=LANE):
    """Pads hidden/action dims to a multiple of `lane`, pads matching in-dims of
    downstream layers, and casts weights to bf16 (MXU native); biases stay f32.
    params_f32: flat list [w0, b0, ..., w_out, b_out], w as (in, out), b as (1, out).
    Done once at parameter-setup time, not in the predict hot path."""
    out = []
    prev_out_pad = None
    n = len(params_f32) // 2
    for li in range(n):
        w = np.asarray(params_f32[2 * li], np.float32)
        b = np.asarray(params_f32[2 * li + 1], np.float32)
        in_dim, out_dim = w.shape
        in_pad = in_dim if prev_out_pad is None else prev_out_pad
        out_pad = _round_up(out_dim, lane)
        w_p = np.zeros((in_pad, out_pad), np.float32)
        w_p[:in_dim, :out_dim] = w
        b_p = np.zeros((1, out_pad), np.float32)
        b_p[:, :out_dim] = b
        out += [jnp.asarray(w_p, jnp.bfloat16), jnp.asarray(b_p, jnp.float32)]
        prev_out_pad = out_pad
    return out


@functools.partial(jax.jit, static_argnames=("single_buffer_weights",))
def dqn_predict(x, params, tasks, task_dims, *, single_buffer_weights=True):
    """x: (B, D) f32; params: prepared (lane-padded, bf16-weight) flat list;
    tasks: (B,) i32 task ids; task_dims: (N_TASKS,) i32 valid-action counts."""
    B, D = x.shape
    n_layers = (len(params) - 2) // 2

    # Batch tile: multiple of 128 (lane-dense out row + clean f32 transpose),
    # capped at 512 (safe across v5e/v6e/v7x VMEM budgets).
    TB = min(512, _round_up(B, LANE))
    B_pad = _round_up(B, TB)
    # v7x: keep >= 2 grid steps when possible so the "parallel" batch axis can
    # span both TensorCores (no-op on v5e/v6e single-TC chips).
    if B_pad // TB == 1 and TB > LANE:
        TB = _round_up((B_pad + 1) // 2, LANE)
        B_pad = _round_up(B, TB)
    grid = (B_pad // TB,)

    # Stream observations as bf16 (the kernel truncates to bf16 anyway).
    x_p = x.astype(jnp.bfloat16)
    if B_pad != B:
        x_p = jnp.pad(x_p, ((0, B_pad - B), (0, 0)))

    # task -> valid-action-count gather in XLA (negligible: B int32s).
    # Padded batch rows get offset 0 -> whole row masked; sliced off below.
    offsets = task_dims.astype(jnp.int32)[tasks.astype(jnp.int32)]
    if B_pad != B:
        offsets = jnp.pad(offsets, (0, B_pad - B))
    offsets = offsets.reshape(1, B_pad)

    kernel = _make_dqn_kernel(n_layers)

    # Weights/biases: full-array blocks, resident across all batch tiles;
    # single-buffer them (constant index_map -> nothing to prefetch).
    if single_buffer_weights:
        w_specs = [pl.BlockSpec(p.shape, lambda i: (0, 0),
                                pipeline_mode=pl.Buffered(1)) for p in params]
    else:
        w_specs = [pl.BlockSpec(p.shape, lambda i: (0, 0)) for p in params]

    in_specs = [
        pl.BlockSpec((TB, D), lambda i: (i, 0)),          # x batch tile (bf16)
        pl.BlockSpec((1, TB), lambda i: (0, i)),          # per-row valid-action offsets
        *w_specs,
    ]
    out_spec = pl.BlockSpec((1, TB), lambda i: (0, i))    # lane-dense actions row

    # VMEM budget: resident weights (single-buffered) + double-buffered x tiles
    # + offsets/out tiles + kernel-internal activation scratch, capped against
    # the generation's physical VMEM.
    w_bytes = sum(int(np.prod(p.shape)) * p.dtype.itemsize for p in params)
    w_bytes *= 1 if single_buffer_weights else 2
    max_w = max(int(p.shape[-1]) for p in params)         # widest padded layer
    Ap = int(params[-1].shape[-1])
    act_bytes = TB * max_w * 6 + TB * Ap * 16             # h (f32+bf16); q, q^T, iota, temps
    io_bytes = 2 * TB * D * 2 + 4 * TB * 4                # dbl-buffered bf16 x + off/out tiles
    vmem_limit = w_bytes + act_bytes + io_bytes + (4 << 20)
    try:
        vmem_cap = int(getattr(pltpu.get_tpu_info(), "vmem_capacity_bytes", 64 << 20))
    except Exception:
        vmem_cap = 64 << 20                               # conservative (v7x physical)
    vmem_limit = int(min(max(vmem_limit, 8 << 20), (vmem_cap * 3) // 4))

    actions = pl.pallas_call(
        kernel,
        out_shape=jax.ShapeDtypeStruct((1, B_pad), jnp.int32),
        grid_spec=pltpu.PrefetchScalarGridSpec(
            num_scalar_prefetch=0,
            grid=grid,
            in_specs=in_specs,
            out_specs=out_spec,
        ),
        compiler_params=pltpu.CompilerParams(
            dimension_semantics=("parallel",),            # batch axis -> 2 TCs on v7x
            vmem_limit_bytes=vmem_limit,
        ),
    )(x_p, offsets, *params)

    return actions.reshape(-1)[:B]                        # .view(-1)


def _reference(x, params, tasks, task_dims):
    """Pure-JAX reference mirroring the kernel's numerics (same padded bf16
    weights, f32 accumulation)."""
    n_layers = (len(params) - 2) // 2
    h = x.astype(jnp.bfloat16)
    k = 0
    for _ in range(n_layers):
        a = jnp.dot(h, params[k], preferred_element_type=jnp.float32) + params[k + 1]
        h = jnp.maximum(a, 0.0).astype(jnp.bfloat16)
        k += 2
    q = jnp.dot(h, params[k], preferred_element_type=jnp.float32) + params[k + 1]
    offsets = task_dims[tasks][:, None]
    col = jnp.arange(q.shape[1])[None, :]
    q = jnp.where(col >= offsets, NEG_MASK, q)
    return jnp.argmax(q, axis=1).astype(jnp.int32)


if __name__ == "__main__":
    # Small, module-consistent shapes.
    B = 8          # batch
    D = 16         # observation_shape
    H = 32         # args.dqn.hidden_dim
    L = 2          # args.dqn.n_layers
    A = 8          # action_space.max_dim
    N_TASKS = 3

    key = jax.random.PRNGKey(0)
    keys = jax.random.split(key, 2 * (L + 1) + 2)

    # Deterministic synthetic parameters; weights stored as (in, out).
    raw_params = []
    in_dim = D
    ki = 0
    for _ in range(L):
        raw_params += [
            jax.random.normal(keys[ki], (in_dim, H), jnp.float32) * 0.1,
            jax.random.normal(keys[ki + 1], (1, H), jnp.float32) * 0.1,
        ]
        in_dim = H
        ki += 2
    raw_params += [
        jax.random.normal(keys[ki], (H, A), jnp.float32) * 0.1,
        jax.random.normal(keys[ki + 1], (1, A), jnp.float32) * 0.1,
    ]
    ki += 2

    # Inputs: observations and per-row task ids.
    x = jax.random.normal(keys[ki], (B, D), jnp.float32)
    tasks = jax.random.randint(keys[ki + 1], (B,), 0, N_TASKS, jnp.int32)

    # action_space.get_dim_at_task(t): per-task valid-action counts.
    task_dims = jnp.array([3, 5, 8], dtype=jnp.int32)

    # One-time parameter prep: pad to lane=128 + bf16 weights.
    params = prepare_params(raw_params)

    try:
        actions = jax.block_until_ready(
            dqn_predict(x, params, tasks, task_dims, single_buffer_weights=True))
    except Exception:
        # Fallback if this JAX build rejects pl.Buffered(1) on resident blocks.
        actions = jax.block_until_ready(
            dqn_predict(x, params, tasks, task_dims, single_buffer_weights=False))

    ref = _reference(x, params, tasks, task_dims)
    np.testing.assert_array_equal(np.asarray(actions).reshape(-1), np.asarray(ref))

    print("KERNEL_OK")
</pallas_src>

<mosaic_0001>
module attributes {stable_mosaic.version = 11 : i64} {
  func.func @kernel(%arg0: i32, %arg1: memref<128x16xbf16, #tpu.memory_space<vmem>>, %arg2: memref<1x128xi32, #tpu.memory_space<vmem>>, %arg3: memref<16x128xbf16, #tpu.memory_space<vmem>>, %arg4: memref<1x128xf32, #tpu.memory_space<vmem>>, %arg5: memref<128x128xbf16, #tpu.memory_space<vmem>>, %arg6: memref<1x128xf32, #tpu.memory_space<vmem>>, %arg7: memref<128x128xbf16, #tpu.memory_space<vmem>>, %arg8: memref<1x128xf32, #tpu.memory_space<vmem>>, %arg9: memref<1x128xi32, #tpu.memory_space<vmem>>) attributes {dimension_semantics = [#tpu.dimension_semantics<parallel>], iteration_bounds = array<i64: 1>, scalar_prefetch = 0 : i64, scratch_operands = 0 : i64, tpu.core_type = #tpu.core_type<tc>, window_params = [{transform_indices = @transform_0, window_bounds = array<i64: 128, 16>}, {transform_indices = @transform_1, window_bounds = array<i64: 1, 128>}, {pipeline_mode = #tpu.pipeline_mode<synchronous>, transform_indices = @transform_2, window_bounds = array<i64: 16, 128>}, {pipeline_mode = #tpu.pipeline_mode<synchronous>, transform_indices = @transform_3, window_bounds = array<i64: 1, 128>}, {pipeline_mode = #tpu.pipeline_mode<synchronous>, transform_indices = @transform_4, window_bounds = array<i64: 128, 128>}, {pipeline_mode = #tpu.pipeline_mode<synchronous>, transform_indices = @transform_5, window_bounds = array<i64: 1, 128>}, {pipeline_mode = #tpu.pipeline_mode<synchronous>, transform_indices = @transform_6, window_bounds = array<i64: 128, 128>}, {pipeline_mode = #tpu.pipeline_mode<synchronous>, transform_indices = @transform_7, window_bounds = array<i64: 1, 128>}, {transform_indices = @transform_8, window_bounds = array<i64: 1, 128>}]} {
    %c0 = arith.constant 0 : index
    %c0_0 = arith.constant 0 : index
    %0 = vector.load %arg1[%c0, %c0_0] : memref<128x16xbf16, #tpu.memory_space<vmem>>, vector<128x16xbf16>
    %c0_1 = arith.constant 0 : index
    %c0_2 = arith.constant 0 : index
    %1 = vector.load %arg3[%c0_1, %c0_2] : memref<16x128xbf16, #tpu.memory_space<vmem>>, vector<16x128xbf16>
    %c0_3 = arith.constant 0 : index
    %c0_4 = arith.constant 0 : index
    %2 = vector.load %arg4[%c0_3, %c0_4] : memref<1x128xf32, #tpu.memory_space<vmem>>, vector<1x128xf32>
    %cst = arith.constant dense<0.000000e+00> : vector<128x128xf32>
    %3 = tpu.matmul %0, %1, %cst {dimension_numbers = #tpu.dot_dimension_numbers<[1], [0], [0], [1], [0, 0, 1, 1], [], []>} : vector<128x16xbf16>, vector<16x128xbf16>, vector<128x128xf32> -> vector<128x128xf32>
    %4 = vector.broadcast %2 : vector<1x128xf32> to vector<128x128xf32>
    %5 = arith.addf %3, %4 : vector<128x128xf32>
    %cst_5 = arith.constant 0.000000e+00 : f32
    %6 = vector.broadcast %cst_5 : f32 to vector<128x128xf32>
    %7 = arith.maximumf %5, %6 : vector<128x128xf32>
    %8 = arith.truncf %7 : vector<128x128xf32> to vector<128x128xbf16>
    %c0_6 = arith.constant 0 : index
    %c0_7 = arith.constant 0 : index
    %9 = vector.load %arg5[%c0_6, %c0_7] : memref<128x128xbf16, #tpu.memory_space<vmem>>, vector<128x128xbf16>
    %c0_8 = arith.constant 0 : index
    %c0_9 = arith.constant 0 : index
    %10 = vector.load %arg6[%c0_8, %c0_9] : memref<1x128xf32, #tpu.memory_space<vmem>>, vector<1x128xf32>
    %cst_10 = arith.constant dense<0.000000e+00> : vector<128x128xf32>
    %11 = tpu.matmul %8, %9, %cst_10 {dimension_numbers = #tpu.dot_dimension_numbers<[1], [0], [0], [1], [0, 0, 1, 1], [], []>} : vector<128x128xbf16>, vector<128x128xbf16>, vector<128x128xf32> -> vector<128x128xf32>
    %12 = vector.broadcast %10 : vector<1x128xf32> to vector<128x128xf32>
    %13 = arith.addf %11, %12 : vector<128x128xf32>
    %cst_11 = arith.constant 0.000000e+00 : f32
    %14 = vector.broadcast %cst_11 : f32 to vector<128x128xf32>
    %15 = arith.maximumf %13, %14 : vector<128x128xf32>
    %16 = arith.truncf %15 : vector<128x128xf32> to vector<128x128xbf16>
    %c0_12 = arith.constant 0 : index
    %c0_13 = arith.constant 0 : index
    %17 = vector.load %arg7[%c0_12, %c0_13] : memref<128x128xbf16, #tpu.memory_space<vmem>>, vector<128x128xbf16>
    %c0_14 = arith.constant 0 : index
    %c0_15 = arith.constant 0 : index
    %18 = vector.load %arg8[%c0_14, %c0_15] : memref<1x128xf32, #tpu.memory_space<vmem>>, vector<1x128xf32>
    %cst_16 = arith.constant dense<0.000000e+00> : vector<128x128xf32>
    %19 = tpu.matmul %16, %17, %cst_16 {dimension_numbers = #tpu.dot_dimension_numbers<[1], [0], [0], [1], [0, 0, 1, 1], [], []>} : vector<128x128xbf16>, vector<128x128xbf16>, vector<128x128xf32> -> vector<128x128xf32>
    %20 = vector.broadcast %18 : vector<1x128xf32> to vector<128x128xf32>
    %21 = arith.addf %19, %20 : vector<128x128xf32>
    %22 = tpu.transpose %21, [1, 0] : vector<128x128xf32> -> vector<128x128xf32>
    %23 = tpu.iota {dimensions = array<i32: 0>} : vector<128x128xi32>
    %c0_17 = arith.constant 0 : index
    %c0_18 = arith.constant 0 : index
    %24 = vector.load %arg2[%c0_17, %c0_18] : memref<1x128xi32, #tpu.memory_space<vmem>>, vector<1x128xi32>
    %25 = vector.broadcast %24 : vector<1x128xi32> to vector<128x128xi32>
    %26 = arith.cmpi sge, %23, %25 : vector<128x128xi32>
    %cst_19 = arith.constant -9.99999979E+10 : f32
    %27 = vector.broadcast %cst_19 : f32 to vector<128x128xf32>
    %28 = arith.select %26, %27, %22 : vector<128x128xi1>, vector<128x128xf32>
    %cst_20 = arith.constant dense<0xFF800000> : vector<128xf32>
    %29 = vector.multi_reduction <maximumf>, %28, %cst_20 [0] : vector<128x128xf32> to vector<128xf32>
    %30 = vector.shape_cast %29 : vector<128xf32> to vector<1x128xf32>
    %31 = vector.broadcast %30 : vector<1x128xf32> to vector<128x128xf32>
    %32 = arith.cmpf oeq, %28, %31 : vector<128x128xf32>
    %c128_i32 = arith.constant 128 : i32
    %33 = vector.broadcast %c128_i32 : i32 to vector<128x128xi32>
    %34 = arith.select %32, %23, %33 : vector<128x128xi1>, vector<128x128xi32>
    %cst_21 = arith.constant dense<2147483647> : vector<128xi32>
    %35 = vector.multi_reduction <minsi>, %34, %cst_21 [0] : vector<128x128xi32> to vector<128xi32>
    %36 = vector.shape_cast %35 : vector<128xi32> to vector<1x128xi32>
    %c0_22 = arith.constant 0 : index
    %c0_23 = arith.constant 0 : index
    %37 = vector.load %arg9[%c0_22, %c0_23] : memref<1x128xi32, #tpu.memory_space<vmem>>, vector<1x128xi32>
    tpu.vector_store %arg9[%c0_22, %c0_23], %36 {strides = array<i32>} : memref<1x128xi32, #tpu.memory_space<vmem>>, vector<1x128xi32>,
    return
  }
  func.func @transform_0(%arg0: i32) -> (i32, i32) {
    %c0_i32 = arith.constant 0 : i32
    %c0_i32_0 = arith.constant 0 : i32
    return %arg0, %c0_i32 : i32, i32
  }
  func.func @transform_1(%arg0: i32) -> (i32, i32) {
    %c0_i32 = arith.constant 0 : i32
    %c0_i32_0 = arith.constant 0 : i32
    return %c0_i32, %arg0 : i32, i32
  }
  func.func @transform_2(%arg0: i32) -> (i32, i32) {
    %c0_i32 = arith.constant 0 : i32
    %c0_i32_0 = arith.constant 0 : i32
    %c0_i32_1 = arith.constant 0 : i32
    return %c0_i32, %c0_i32_0 : i32, i32
  }
  func.func @transform_3(%arg0: i32) -> (i32, i32) {
    %c0_i32 = arith.constant 0 : i32
    %c0_i32_0 = arith.constant 0 : i32
    %c0_i32_1 = arith.constant 0 : i32
    return %c0_i32, %c0_i32_0 : i32, i32
  }
  func.func @transform_4(%arg0: i32) -> (i32, i32) {
    %c0_i32 = arith.constant 0 : i32
    %c0_i32_0 = arith.constant 0 : i32
    %c0_i32_1 = arith.constant 0 : i32
    return %c0_i32, %c0_i32_0 : i32, i32
  }
  func.func @transform_5(%arg0: i32) -> (i32, i32) {
    %c0_i32 = arith.constant 0 : i32
    %c0_i32_0 = arith.constant 0 : i32
    %c0_i32_1 = arith.constant 0 : i32
    return %c0_i32, %c0_i32_0 : i32, i32
  }
  func.func @transform_6(%arg0: i32) -> (i32, i32) {
    %c0_i32 = arith.constant 0 : i32
    %c0_i32_0 = arith.constant 0 : i32
    %c0_i32_1 = arith.constant 0 : i32
    return %c0_i32, %c0_i32_0 : i32, i32
  }
  func.func @transform_7(%arg0: i32) -> (i32, i32) {
    %c0_i32 = arith.constant 0 : i32
    %c0_i32_0 = arith.constant 0 : i32
    %c0_i32_1 = arith.constant 0 : i32
    return %c0_i32, %c0_i32_0 : i32, i32
  }
  func.func @transform_8(%arg0: i32) -> (i32, i32) {
    %c0_i32 = arith.constant 0 : i32
    %c0_i32_0 = arith.constant 0 : i32
    return %c0_i32, %arg0 : i32, i32
  }
}

module attributes {stable_mosaic.version = 11 : i64} {
  func.func @kernel(%arg0: i32, %arg1: memref<128x16xbf16, #tpu.memory_space<vmem>>, %arg2: memref<1x128xi32, #tpu.memory_space<vmem>>, %arg3: memref<16x128xbf16, #tpu.memory_space<vmem>>, %arg4: memref<1x128xf32, #tpu.memory_space<vmem>>, %arg5: memref<128x128xbf16, #tpu.memory_space<vmem>>, %arg6: memref<1x128xf32, #tpu.memory_space<vmem>>, %arg7: memref<128x128xbf16, #tpu.memory_space<vmem>>, %arg8: memref<1x128xf32, #tpu.memory_space<vmem>>, %arg9: memref<1x128xi32, #tpu.memory_space<vmem>>) attributes {dimension_semantics = [#tpu.dimension_semantics<parallel>], iteration_bounds = array<i64: 1>, scalar_prefetch = 0 : i64, scratch_operands = 0 : i64, tpu.core_type = #tpu.core_type<tc>, window_params = [{transform_indices = @transform_0, window_bounds = array<i64: 128, 16>}, {transform_indices = @transform_1, window_bounds = array<i64: 1, 128>}, {pipeline_mode = #tpu.pipeline_mode<synchronous>, transform_indices = @transform_2, window_bounds = array<i64: 16, 128>}, {pipeline_mode = #tpu.pipeline_mode<synchronous>, transform_indices = @transform_3, window_bounds = array<i64: 1, 128>}, {pipeline_mode = #tpu.pipeline_mode<synchronous>, transform_indices = @transform_4, window_bounds = array<i64: 128, 128>}, {pipeline_mode = #tpu.pipeline_mode<synchronous>, transform_indices = @transform_5, window_bounds = array<i64: 1, 128>}, {pipeline_mode = #tpu.pipeline_mode<synchronous>, transform_indices = @transform_6, window_bounds = array<i64: 128, 128>}, {pipeline_mode = #tpu.pipeline_mode<synchronous>, transform_indices = @transform_7, window_bounds = array<i64: 1, 128>}, {transform_indices = @transform_8, window_bounds = array<i64: 1, 128>}]} {
    %c0 = arith.constant 0 : index
    %c0_0 = arith.constant 0 : index
    %0 = vector.load %arg1[%c0, %c0_0] : memref<128x16xbf16, #tpu.memory_space<vmem>>, vector<128x16xbf16>
    %c0_1 = arith.constant 0 : index
    %c0_2 = arith.constant 0 : index
    %1 = vector.load %arg3[%c0_1, %c0_2] : memref<16x128xbf16, #tpu.memory_space<vmem>>, vector<16x128xbf16>
    %c0_3 = arith.constant 0 : index
    %c0_4 = arith.constant 0 : index
    %2 = vector.load %arg4[%c0_3, %c0_4] : memref<1x128xf32, #tpu.memory_space<vmem>>, vector<1x128xf32>
    %cst = arith.constant dense<0.000000e+00> : vector<128x128xf32>
    %3 = tpu.matmul %0, %1, %cst {dimension_numbers = #tpu.dot_dimension_numbers<[1], [0], [0], [1], [0, 0, 1, 1], [], []>} : vector<128x16xbf16>, vector<16x128xbf16>, vector<128x128xf32> -> vector<128x128xf32>
    %4 = vector.broadcast %2 : vector<1x128xf32> to vector<128x128xf32>
    %5 = arith.addf %3, %4 : vector<128x128xf32>
    %cst_5 = arith.constant 0.000000e+00 : f32
    %6 = vector.broadcast %cst_5 : f32 to vector<128x128xf32>
    %7 = arith.maximumf %5, %6 : vector<128x128xf32>
    %8 = arith.truncf %7 : vector<128x128xf32> to vector<128x128xbf16>
    %c0_6 = arith.constant 0 : index
    %c0_7 = arith.constant 0 : index
    %9 = vector.load %arg5[%c0_6, %c0_7] : memref<128x128xbf16, #tpu.memory_space<vmem>>, vector<128x128xbf16>
    %c0_8 = arith.constant 0 : index
    %c0_9 = arith.constant 0 : index
    %10 = vector.load %arg6[%c0_8, %c0_9] : memref<1x128xf32, #tpu.memory_space<vmem>>, vector<1x128xf32>
    %cst_10 = arith.constant dense<0.000000e+00> : vector<128x128xf32>
    %11 = tpu.matmul %8, %9, %cst_10 {dimension_numbers = #tpu.dot_dimension_numbers<[1], [0], [0], [1], [0, 0, 1, 1], [], []>} : vector<128x128xbf16>, vector<128x128xbf16>, vector<128x128xf32> -> vector<128x128xf32>
    %12 = vector.broadcast %10 : vector<1x128xf32> to vector<128x128xf32>
    %13 = arith.addf %11, %12 : vector<128x128xf32>
    %cst_11 = arith.constant 0.000000e+00 : f32
    %14 = vector.broadcast %cst_11 : f32 to vector<128x128xf32>
    %15 = arith.maximumf %13, %14 : vector<128x128xf32>
    %16 = arith.truncf %15 : vector<128x128xf32> to vector<128x128xbf16>
    %c0_12 = arith.constant 0 : index
    %c0_13 = arith.constant 0 : index
    %17 = vector.load %arg7[%c0_12, %c0_13] : memref<128x128xbf16, #tpu.memory_space<vmem>>, vector<128x128xbf16>
    %c0_14 = arith.constant 0 : index
    %c0_15 = arith.constant 0 : index
    %18 = vector.load %arg8[%c0_14, %c0_15] : memref<1x128xf32, #tpu.memory_space<vmem>>, vector<1x128xf32>
    %cst_16 = arith.constant dense<0.000000e+00> : vector<128x128xf32>
    %19 = tpu.matmul %16, %17, %cst_16 {dimension_numbers = #tpu.dot_dimension_numbers<[1], [0], [0], [1], [0, 0, 1, 1], [], []>} : vector<128x128xbf16>, vector<128x128xbf16>, vector<128x128xf32> -> vector<128x128xf32>
    %20 = vector.broadcast %18 : vector<1x128xf32> to vector<128x128xf32>
    %21 = arith.addf %19, %20 : vector<128x128xf32>
    %22 = tpu.transpose %21, [1, 0] : vector<128x128xf32> -> vector<128x128xf32>
    %23 = tpu.iota {dimensions = array<i32: 0>} : vector<128x128xi32>
    %c0_17 = arith.constant 0 : index
    %c0_18 = arith.constant 0 : index
    %24 = vector.load %arg2[%c0_17, %c0_18] : memref<1x128xi32, #tpu.memory_space<vmem>>, vector<1x128xi32>
    %25 = vector.broadcast %24 : vector<1x128xi32> to vector<128x128xi32>
    %26 = arith.cmpi sge, %23, %25 : vector<128x128xi32>
    %cst_19 = arith.constant -9.99999979E+10 : f32
    %27 = vector.broadcast %cst_19 : f32 to vector<128x128xf32>
    %28 = arith.select %26, %27, %22 : vector<128x128xi1>, vector<128x128xf32>
    %cst_20 = arith.constant dense<0xFF800000> : vector<128xf32>
    %29 = vector.multi_reduction <maximumf>, %28, %cst_20 [0] : vector<128x128xf32> to vector<128xf32>
    %30 = vector.shape_cast %29 : vector<128xf32> to vector<1x128xf32>
    %31 = vector.broadcast %30 : vector<1x128xf32> to vector<128x128xf32>
    %32 = arith.cmpf oeq, %28, %31 : vector<128x128xf32>
    %c128_i32 = arith.constant 128 : i32
    %33 = vector.broadcast %c128_i32 : i32 to vector<128x128xi32>
    %34 = arith.select %32, %23, %33 : vector<128x128xi1>, vector<128x128xi32>
    %cst_21 = arith.constant dense<2147483647> : vector<128xi32>
    %35 = vector.multi_reduction <minsi>, %34, %cst_21 [0] : vector<128x128xi32> to vector<128xi32>
    %36 = vector.shape_cast %35 : vector<128xi32> to vector<1x128xi32>
    %c0_22 = arith.constant 0 : index
    %c0_23 = arith.constant 0 : index
    %37 = vector.load %arg9[%c0_22, %c0_23] : memref<1x128xi32, #tpu.memory_space<vmem>>, vector<1x128xi32>
    tpu.vector_store %arg9[%c0_22, %c0_23], %36 {strides = array<i32>} : memref<1x128xi32, #tpu.memory_space<vmem>>, vector<1x128xi32>,
    return
  }
  func.func @transform_0(%arg0: i32) -> (i32, i32) {
    %c0_i32 = arith.constant 0 : i32
    %c0_i32_0 = arith.constant 0 : i32
    return %arg0, %c0_i32 : i32, i32
  }
  func.func @transform_1(%arg0: i32) -> (i32, i32) {
    %c0_i32 = arith.constant 0 : i32
    %c0_i32_0 = arith.constant 0 : i32
    return %c0_i32, %arg0 : i32, i32
  }
  func.func @transform_2(%arg0: i32) -> (i32, i32) {
    %c0_i32 = arith.constant 0 : i32
    %c0_i32_0 = arith.constant 0 : i32
    %c0_i32_1 = arith.constant 0 : i32
    return %c0_i32, %c0_i32_0 : i32, i32
  }
  func.func @transform_3(%arg0: i32) -> (i32, i32) {
    %c0_i32 = arith.constant 0 : i32
    %c0_i32_0 = arith.constant 0 : i32
    %c0_i32_1 = arith.constant 0 : i32
    return %c0_i32, %c0_i32_0 : i32, i32
  }
  func.func @transform_4(%arg0: i32) -> (i32, i32) {
    %c0_i32 = arith.constant 0 : i32
    %c0_i32_0 = arith.constant 0 : i32
    %c0_i32_1 = arith.constant 0 : i32
    return %c0_i32, %c0_i32_0 : i32, i32
  }
  func.func @transform_5(%arg0: i32) -> (i32, i32) {
    %c0_i32 = arith.constant 0 : i32
    %c0_i32_0 = arith.constant 0 : i32
    %c0_i32_1 = arith.constant 0 : i32
    return %c0_i32, %c0_i32_0 : i32, i32
  }
  func.func @transform_6(%arg0: i32) -> (i32, i32) {
    %c0_i32 = arith.constant 0 : i32
    %c0_i32_0 = arith.constant 0 : i32
    %c0_i32_1 = arith.constant 0 : i32
    return %c0_i32, %c0_i32_0 : i32, i32
  }
  func.func @transform_7(%arg0: i32) -> (i32, i32) {
    %c0_i32 = arith.constant 0 : i32
    %c0_i32_0 = arith.constant 0 : i32
    %c0_i32_1 = arith.constant 0 : i32
    return %c0_i32, %c0_i32_0 : i32, i32
  }
  func.func @transform_8(%arg0: i32) -> (i32, i32) {
    %c0_i32 = arith.constant 0 : i32
    %c0_i32_0 = arith.constant 0 : i32
    return %c0_i32, %arg0 : i32, i32
  }
}

</mosaic_0001>

<bundles_post_ra>
// kernel: dqn_predict.1
= control target key start
LH: loop header
LB: loop body
LE: loop exit
PB: predicated region body
PF: predicated region fallthrough
CT: control target
= control target key end

     0   :  { %vm98_vm0 = vcmask 130048   ;;  %s1087_s2 = inlined_call_operand.vmem [shape: bf16[16,128], index: 2, kind: input, shape index: {}]   ;;  %s1088_s0 = inlined_call_operand.vmem [shape: bf16[128,16], index: 0, kind: input, shape index: {}]   ;;  %s1089_s3 = inlined_call_operand.vmem [shape: f32[1,128], index: 3, kind: input, shape index: {}]   ;;  %s1090_s4 = inlined_call_operand.vmem [shape: bf16[128,128], index: 4, kind: input, shape index: {}]   ;;  %s1091_s5 = inlined_call_operand.vmem [shape: f32[1,128], index: 5, kind: input, shape index: {}]   ;;  %s1092_s6 = inlined_call_operand.vmem [shape: bf16[128,128], index: 6, kind: input, shape index: {}]   ;;  %s1093_s7 = inlined_call_operand.vmem [shape: f32[1,128], index: 7, kind: input, shape index: {}]   ;;  %s1094_s1 = inlined_call_operand.vmem [shape: s32[1,128], index: 1, kind: input, shape index: {}]   ;;  %s1095_s8 = inlined_call_operand.vmem [shape: s32[1,128], index: 8, kind: output, shape index: {}]  }
   0x1   :  { %v750_v0 = vld [vmem:[%s1087_s2] sm:$0xff]  ;;  %v743_v2 = vld [vmem:[%s1088_s0 + $0x8] sm:$0xff]  ;;  %v744_v3 = vld [vmem:[%s1088_s0 + $0x10] sm:$0xff] }
   0x2   :  { %v742_v1 = vld [vmem:[%s1088_s0] sm:$0xff]  ;;  %130 = vmatpush.bf16.msra.mxu0 %v750_v0  ;;  %v745_v4 = vld [vmem:[%s1088_s0 + $0x18] sm:$0xff]  ;;  %v747_v7 = vld [vmem:[%s1088_s0 + $0x28] sm:$0xff] }
   0x3   :  { %v746_v5 = vld [vmem:[%s1088_s0 + $0x20] sm:$0xff]  ;;  %v758_v6 = vld [vmem:[%s1090_s4 + $0x38] sm:$0xff]  ;;  %v757_v8 = vld [vmem:[%s1090_s4 + $0x30] sm:$0xff] }
   0x4   :  { %264 = vmatpush.bf16.msra.mxu1 %v758_v6  ;;  %767 = vmatpush.bf16.msra.mxu3 %v758_v6  ;;  %v756_v9 = vld [vmem:[%s1090_s4 + $0x28] sm:$0xff]  ;;  %v755_v10 = vld [vmem:[%s1090_s4 + $0x20] sm:$0xff]  ;;  %v754_v11 = vld [vmem:[%s1090_s4 + $0x18] sm:$0xff] }
   0x5   :  { %670 = vmatmul.msk.bf16.vlgmr.msra.gmra.mxu0 %vm98_vm0, %v742_v1  ;;  %v748_v12 = vld [vmem:[%s1088_s0 + $0x30] sm:$0xff]  ;;  %v752_v14 = vld [vmem:[%s1090_s4 + $0x8] sm:$0xff]  ;;  %v751_v15 = vld [vmem:[%s1090_s4] sm:$0xff] }
   0x6   :  { %v753_v13 = vld [vmem:[%s1090_s4 + $0x10] sm:$0xff]  ;;  %v749_v16 = vld [vmem:[%s1088_s0 + $0x38] sm:$0xff]  ;;  %v894_v18 = vld [vmem:[%s1089_s3] ss:$0 sm:$0xff] }
   0x7   :  { %v766_v57 = vld [vmem:[%s1092_s6 + $0x38] sm:$0xff]  ;;  %v765_v61 = vld [vmem:[%s1092_s6 + $0x30] sm:$0xff]  ;;  %v764_v63 = vld [vmem:[%s1092_s6 + $0x28] sm:$0xff] }
   0x8   :  { %265 = vmatpush.bf16.msra.mxu1 %v757_v8  ;;  %768 = vmatpush.bf16.msra.mxu3 %v757_v8  ;;  %v763_v0 = vld [vmem:[%s1092_s6 + $0x20] sm:$0xff]  ;;  %v761_v8 = vld [vmem:[%s1092_s6 + $0x10] sm:$0xff] }
   0x9   :  { %405 = vmatpush.bf16.msra.mxu2 %v766_v57 }
   0xc   :  { %266 = vmatpush.bf16.msra.mxu1 %v756_v9  ;;  %769 = vmatpush.bf16.msra.mxu3 %v756_v9 }
   0xd   :  { %406 = vmatpush.bf16.msra.mxu2 %v765_v61 }
  0x10   :  { %267 = vmatpush.bf16.msra.mxu1 %v755_v10  ;;  %770 = vmatpush.bf16.msra.mxu3 %v755_v10  ;;  %v760_v10 = vld [vmem:[%s1092_s6 + $0x8] sm:$0xff] }
  0x11   :  { %407 = vmatpush.bf16.msra.mxu2 %v764_v63 }
  0x14   :  { %268 = vmatpush.bf16.msra.mxu1 %v754_v11  ;;  %771 = vmatpush.bf16.msra.mxu3 %v754_v11  ;;  %v759_v11 = vld [vmem:[%s1092_s6] sm:$0xff] }
  0x15   :  { %671 = vmatmul.msk.bf16.gmra.mxu0 %vm98_vm0, %v743_v2  ;;  %408 = vmatpush.bf16.msra.mxu2 %v763_v0 }
  0x18   :  { %269 = vmatpush.bf16.msra.mxu1 %v753_v13  ;;  %772 = vmatpush.bf16.msra.mxu3 %v753_v13 }
  0x1c   :  { %270 = vmatpush.bf16.msra.mxu1 %v752_v14  ;;  %773 = vmatpush.bf16.msra.mxu3 %v752_v14 }
  0x20   :  { %271 = vmatpush.bf16.msra.mxu1 %v751_v15  ;;  %774 = vmatpush.bf16.msra.mxu3 %v751_v15 }
  0x24   :  { %775 = vmatpush.bf16.msrb.mxu3 %v766_v57 }
  0x25   :  { %672 = vmatmul.msk.bf16.gmra.mxu0 %vm98_vm0, %v744_v3 }
  0x28   :  { %776 = vmatpush.bf16.msrb.mxu3 %v765_v61 }
  0x2c   :  { %777 = vmatpush.bf16.msrb.mxu3 %v764_v63 }
  0x30   :  { %778 = vmatpush.bf16.msrb.mxu3 %v763_v0 }
  0x35   :  { %673 = vmatmul.msk.bf16.gmra.mxu0 %vm98_vm0, %v745_v4  ;;  %v762_v4 = vld [vmem:[%s1092_s6 + $0x18] sm:$0xff] }
  0x36   :  { %409 = vmatpush.bf16.msra.mxu2 %v762_v4  ;;  %779 = vmatpush.bf16.msrb.mxu3 %v762_v4 }
  0x3a   :  { %410 = vmatpush.bf16.msra.mxu2 %v761_v8  ;;  %780 = vmatpush.bf16.msrb.mxu3 %v761_v8 }
  0x3e   :  { %411 = vmatpush.bf16.msra.mxu2 %v760_v10  ;;  %781 = vmatpush.bf16.msrb.mxu3 %v760_v10 }
  0x42   :  { %412 = vmatpush.bf16.msra.mxu2 %v759_v11  ;;  %782 = vmatpush.bf16.msrb.mxu3 %v759_v11  ;;  %v785_v11 = vld [vmem:[%s1093_s7] ss:$0 sm:$0xff] }
  0x45   :  { %674 = vmatmul.msk.bf16.gmra.mxu0 %vm98_vm0, %v746_v5 }
  0x55   :  { %675 = vmatmul.msk.bf16.gmra.mxu0 %vm98_vm0, %v747_v7 }
  0x65   :  { %676 = vmatmul.msk.bf16.gmra.mxu0 %vm98_vm0, %v748_v12 }
  0x75   :  { %677 = vmatmul.msk.bf16.gmra.mxu0 %vm98_vm0, %v749_v16 }
  0x82   :  { %v132_v17 = vpop.f32.mrf.mxu0 }
  0x83   :  { %v133_v19 = vadd.f32 %v894_v18, %v132_v17 }
  0x85   :  { %v172_v22 = vmax.f32 %v133_v19, 0.0 }
  0x8a   :  { %v134_v20 = vpop.f32.mrf.mxu0 }
  0x8b   :  { %v135_v21 = vadd.f32 %v894_v18, %v134_v20  ;;  %v784_v20 = vld [vmem:[%s1091_s5] ss:$0 sm:$0xff] }
  0x8d   :  { %v173_v23 = vmax.f32 %v135_v21, 0.0 }
  0x8f   :  { %v188_v24 = vpack.c.bf16 %v173_v23, %v172_v22 }
  0x91   :  { %272 = vmatmul.bf16.vlgmr.msra.gmra.mxu1 %v188_v24 }
  0x92   :  { %v137_v25 = vpop.f32.mrf.mxu0 }
  0x93   :  { %v138_v26 = vadd.f32 %v894_v18, %v137_v25 }
  0x95   :  { %v174_v29 = vmax.f32 %v138_v26, 0.0 }
  0x9a   :  { %v139_v27 = vpop.f32.mrf.mxu0 }
  0x9b   :  { %v140_v28 = vadd.f32 %v894_v18, %v139_v27 }
  0x9d   :  { %v175_v30 = vmax.f32 %v140_v28, 0.0 }
  0x9f   :  { %v189_v31 = vpack.c.bf16 %v175_v30, %v174_v29 }
  0xa1   :  { %277 = vmatmul.bf16.gmra.mxu1 %v189_v31 }
  0xa2   :  { %v142_v32 = vpop.f32.mrf.mxu0 }
  0xa3   :  { %v143_v33 = vadd.f32 %v894_v18, %v142_v32 }
  0xa5   :  { %v176_v36 = vmax.f32 %v143_v33, 0.0 }
  0xaa   :  { %v144_v34 = vpop.f32.mrf.mxu0 }
  0xab   :  { %v145_v35 = vadd.f32 %v894_v18, %v144_v34 }
  0xad   :  { %v177_v37 = vmax.f32 %v145_v35, 0.0 }
  0xaf   :  { %v190_v38 = vpack.c.bf16 %v177_v37, %v176_v36 }
  0xb1   :  { %282 = vmatmul.bf16.gmra.mxu1 %v190_v38 }
  0xb2   :  { %v147_v39 = vpop.f32.mrf.mxu0 }
  0xb3   :  { %v148_v40 = vadd.f32 %v894_v18, %v147_v39 }
  0xb5   :  { %v178_v43 = vmax.f32 %v148_v40, 0.0 }
  0xba   :  { %v149_v41 = vpop.f32.mrf.mxu0 }
  0xbb   :  { %v150_v42 = vadd.f32 %v894_v18, %v149_v41 }
  0xbd   :  { %v179_v44 = vmax.f32 %v150_v42, 0.0 }
  0xbf   :  { %v191_v45 = vpack.c.bf16 %v179_v44, %v178_v43 }
  0xc1   :  { %287 = vmatmul.bf16.gmra.mxu1 %v191_v45 }
  0xc2   :  { %v152_v46 = vpop.f32.mrf.mxu0 }
  0xc3   :  { %v153_v47 = vadd.f32 %v894_v18, %v152_v46 }
  0xc5   :  { %v180_v50 = vmax.f32 %v153_v47, 0.0 }
  0xca   :  { %v154_v48 = vpop.f32.mrf.mxu0 }
  0xcb   :  { %v155_v49 = vadd.f32 %v894_v18, %v154_v48 }
  0xcd   :  { %v181_v51 = vmax.f32 %v155_v49, 0.0 }
  0xcf   :  { %v192_v52 = vpack.c.bf16 %v181_v51, %v180_v50 }
  0xd1   :  { %292 = vmatmul.bf16.gmra.mxu1 %v192_v52 }
  0xd2   :  { %v157_v53 = vpop.f32.mrf.mxu0 }
  0xd3   :  { %v158_v54 = vadd.f32 %v894_v18, %v157_v53 }
  0xd5   :  { %v182_v58 = vmax.f32 %v158_v54, 0.0 }
  0xda   :  { %v159_v55 = vpop.f32.mrf.mxu0 }
  0xdb   :  { %v160_v56 = vadd.f32 %v894_v18, %v159_v55 }
  0xdd   :  { %v183_v59 = vmax.f32 %v160_v56, 0.0 }
  0xdf   :  { %v193_v60 = vpack.c.bf16 %v183_v59, %v182_v58 }
  0xe1   :  { %297 = vmatmul.bf16.gmra.mxu1 %v193_v60 }
  0xe2   :  { %v162_v62 = vpop.f32.mrf.mxu0 }
  0xe3   :  { %v163_v1 = vadd.f32 %v894_v18, %v162_v62 }
  0xe5   :  { %v184_v5 = vmax.f32 %v163_v1, 0.0 }
  0xea   :  { %v164_v2 = vpop.f32.mrf.mxu0 }
  0xeb   :  { %v165_v3 = vadd.f32 %v894_v18, %v164_v2 }
  0xed   :  { %v185_v6 = vmax.f32 %v165_v3, 0.0 }
  0xef   :  { %v194_v7 = vpack.c.bf16 %v185_v6, %v184_v5 }
  0xf1   :  { %302 = vmatmul.bf16.vlgmr.msra.gmra.mxu3 %v194_v7 }
  0xf2   :  { %v167_v9 = vpop.f32.mrf.mxu0 }
  0xf3   :  { %v168_v12 = vadd.f32 %v894_v18, %v167_v9 }
  0xf5   :  { %v186_v15 = vmax.f32 %v168_v12, 0.0 }
  0xfa   :  { %v169_v13 = vpop.f32.mrf.mxu0 }
  0xfb   :  { %v170_v14 = vadd.f32 %v894_v18, %v169_v13 }
  0xfd   :  { %v187_v16 = vmax.f32 %v170_v14, 0.0 }
  0xff   :  { %v195_v17 = vpack.c.bf16 %v187_v16, %v186_v15 }
 0x101   :  { %307 = vmatmul.bf16.gmra.mxu3 %v195_v17 }
 0x10e   :  { %v273_v19 = vpop.f32.mrf.mxu1 }
 0x10f   :  { %v274_v21 = vadd.f32 %v784_v20, %v273_v19 }
 0x111   :  { %v313_v24 = vmax.f32 %v274_v21, 0.0 }
 0x116   :  { %v275_v22 = vpop.f32.mrf.mxu1 }
 0x117   :  { %v276_v23 = vadd.f32 %v784_v20, %v275_v22 }
 0x119   :  { %v314_v25 = vmax.f32 %v276_v23, 0.0 }
 0x11b   :  { %v329_v26 = vpack.c.bf16 %v314_v25, %v313_v24 }
 0x11d   :  { %413 = vmatmul.bf16.vlgmr.msra.gmra.mxu2 %v329_v26 }
 0x11e   :  { %v278_v27 = vpop.f32.mrf.mxu1 }
 0x11f   :  { %v279_v28 = vadd.f32 %v784_v20, %v278_v27 }
 0x121   :  { %v315_v30 = vmax.f32 %v279_v28, 0.0 }
 0x126   :  { %v280_v29 = vpop.f32.mrf.mxu1 }
 0x127   :  { %v281_v18 = vadd.f32 %v784_v20, %v280_v29 }
 0x129   :  { %v316_v31 = vmax.f32 %v281_v18, 0.0 }
 0x12b   :  { %v330_v32 = vpack.c.bf16 %v316_v31, %v315_v30 }
 0x12d   :  { %418 = vmatmul.bf16.gmra.mxu2 %v330_v32 }
 0x12e   :  { %v283_v33 = vpop.f32.mrf.mxu1 }
 0x12f   :  { %v284_v34 = vadd.f32 %v784_v20, %v283_v33 }
 0x131   :  { %v317_v37 = vmax.f32 %v284_v34, 0.0 }
 0x136   :  { %v285_v35 = vpop.f32.mrf.mxu1 }
 0x137   :  { %v286_v36 = vadd.f32 %v784_v20, %v285_v35 }
 0x139   :  { %v318_v38 = vmax.f32 %v286_v36, 0.0 }
 0x13b   :  { %v331_v39 = vpack.c.bf16 %v318_v38, %v317_v37 }
 0x13d   :  { %423 = vmatmul.bf16.gmra.mxu2 %v331_v39 }
 0x13e   :  { %v288_v40 = vpop.f32.mrf.mxu1 }
 0x13f   :  { %v289_v41 = vadd.f32 %v784_v20, %v288_v40 }
 0x141   :  { %v319_v44 = vmax.f32 %v289_v41, 0.0 }
 0x146   :  { %v290_v42 = vpop.f32.mrf.mxu1 }
 0x147   :  { %v291_v43 = vadd.f32 %v784_v20, %v290_v42 }
 0x149   :  { %v320_v45 = vmax.f32 %v291_v43, 0.0 }
 0x14b   :  { %v332_v46 = vpack.c.bf16 %v320_v45, %v319_v44 }
 0x14d   :  { %428 = vmatmul.bf16.gmra.mxu2 %v332_v46 }
 0x14e   :  { %v293_v47 = vpop.f32.mrf.mxu1 }
 0x14f   :  { %v294_v48 = vadd.f32 %v784_v20, %v293_v47  ;;  %v486_v47 = vlaneseq }
 0x151   :  { %v321_v51 = vmax.f32 %v294_v48, 0.0  ;;  %v942_v48 = vshrl.u32 %v486_v47, 7 }
 0x156   :  { %v295_v49 = vpop.f32.mrf.mxu1 }
 0x157   :  { %v296_v50 = vadd.f32 %v784_v20, %v295_v49 }
 0x159   :  { %v322_v52 = vmax.f32 %v296_v50, 0.0  ;;  %v947_v50 = vld [vmem:[%s1094_s1] ss:$0 sm:$0xff] }
 0x15a   :  { %vm505_vm1 = vcmp.ge.s32.totalorder %v942_v48, %v947_v50 }
 0x15b   :  { %v333_v53 = vpack.c.bf16 %v322_v52, %v321_v51  ;;  %v950_v51 = vadd.s32 32, %v942_v48 }
 0x15d   :  { %433 = vmatmul.bf16.gmra.mxu2 %v333_v53  ;;  %vm509_vm2 = vcmp.ge.s32.totalorder %v950_v51, %v947_v50 }
 0x15e   :  { %v298_v54 = vpop.f32.mrf.mxu1 }
 0x15f   :  { %v299_v55 = vadd.f32 %v784_v20, %v298_v54 }
 0x161   :  { %v323_v58 = vmax.f32 %v299_v55, 0.0  ;;  %v961_v55 = vadd.s32 8, %v942_v48 }
 0x163   :  { %vm506_vm3 = vcmp.ge.s32.totalorder %v961_v55, %v947_v50 }
 0x166   :  { %v300_v56 = vpop.f32.mrf.mxu1 }
 0x167   :  { %v301_v57 = vadd.f32 %v784_v20, %v300_v56 }
 0x169   :  { %v324_v59 = vmax.f32 %v301_v57, 0.0  ;;  %v966_v57 = vadd.s32 40, %v942_v48 }
 0x16b   :  { %v334_v60 = vpack.c.bf16 %v324_v59, %v323_v58  ;;  %vm510_vm4 = vcmp.ge.s32.totalorder %v966_v57, %v947_v50 }
 0x16d   :  { %438 = vmatmul.bf16.gmra.mxu2 %v334_v60 }
 0x174   :  { %v303_v61 = vpop.f32.mrf.mxu3 }
 0x175   :  { %v304_v62 = vadd.f32 %v784_v20, %v303_v61  ;;  %v977_v61 = vadd.s32 16, %v942_v48 }
 0x177   :  { %v325_v1 = vmax.f32 %v304_v62, 0.0  ;;  %vm507_vm5 = vcmp.ge.s32.totalorder %v977_v61, %v947_v50 }
 0x17c   :  { %v305_v63 = vpop.f32.mrf.mxu3 }
 0x17d   :  { %v306_v0 = vadd.f32 %v784_v20, %v305_v63  ;;  %v982_v63 = vadd.s32 48, %v942_v48 }
 0x17f   :  { %v326_v2 = vmax.f32 %v306_v0, 0.0  ;;  %vm511_vm6 = vcmp.ge.s32.totalorder %v982_v63, %v947_v50 }
 0x181   :  { %v335_v3 = vpack.c.bf16 %v326_v2, %v325_v1 }
 0x183   :  { %443 = vmatmul.bf16.vlgmr.msrb.gmra.mxu3 %v335_v3 }
 0x184   :  { %v308_v4 = vpop.f32.mrf.mxu3 }
 0x185   :  { %v309_v5 = vadd.f32 %v784_v20, %v308_v4 }
 0x187   :  { %v327_v8 = vmax.f32 %v309_v5, 0.0 }
 0x18c   :  { %v310_v6 = vpop.f32.mrf.mxu3 }
 0x18d   :  { %v311_v7 = vadd.f32 %v784_v20, %v310_v6 }
 0x18f   :  { %v328_v9 = vmax.f32 %v311_v7, 0.0 }
 0x191   :  { %v336_v10 = vpack.c.bf16 %v328_v9, %v327_v8  ;;  %v995_v9 = vadd.s32 64, %v942_v48 }
 0x193   :  { %448 = vmatmul.bf16.gmra.mxu3 %v336_v10  ;;  %v998_v10 = vadd.s32 72, %v942_v48  ;;  %vm513_vm7 = vcmp.ge.s32.totalorder %v995_v9, %v947_v50 }
 0x195   :  { %vm514_vm8 = vcmp.ge.s32.totalorder %v998_v10, %v947_v50 }
 0x1a0   :  { %v414_v12 = vpop.f32.mrf.mxu2 }
 0x1a1   :  { %v415_v13 = vadd.f32 %v785_v11, %v414_v12  ;;  %v1001_v12 = vadd.s32 96, %v942_v48 }
 0x1a3   :  { %454 = vxpose.xlu0.b32.start [1/16] %v415_v13, 128  ;;  %v1008_v13 = vadd.s32 104, %v942_v48  ;;  %vm517_vm9 = vcmp.ge.s32.totalorder %v1001_v12, %v947_v50 }
 0x1a5   :  { %vm518_vm10 = vcmp.ge.s32.totalorder %v1008_v13, %v947_v50 }
 0x1a8   :  { %v416_v14 = vpop.f32.mrf.mxu2 }
 0x1a9   :  { %v417_v15 = vadd.f32 %v785_v11, %v416_v14 }
 0x1ab   :  { %455 = vxpose.xlu0.b32.cont [2/16] %v417_v15, 128 }
 0x1b0   :  { %v419_v16 = vpop.f32.mrf.mxu2 }
 0x1b1   :  { %v420_v17 = vadd.f32 %v785_v11, %v419_v16 }
 0x1b3   :  { %456 = vxpose.xlu0.b32.cont [3/16] %v420_v17, 128 }
 0x1b8   :  { %v421_v19 = vpop.f32.mrf.mxu2 }
 0x1b9   :  { %v422_v21 = vadd.f32 %v785_v11, %v421_v19 }
 0x1bb   :  { %457 = vxpose.xlu0.b32.cont [4/16] %v422_v21, 128 }
 0x1c0   :  { %v424_v20 = vpop.f32.mrf.mxu2 }
 0x1c1   :  { %v425_v22 = vadd.f32 %v785_v11, %v424_v20 }
 0x1c3   :  { %458 = vxpose.xlu0.b32.cont [5/16] %v425_v22, 128 }
 0x1c8   :  { %v426_v23 = vpop.f32.mrf.mxu2 }
 0x1c9   :  { %v427_v24 = vadd.f32 %v785_v11, %v426_v23 }
 0x1cb   :  { %459 = vxpose.xlu0.b32.cont [6/16] %v427_v24, 128  ;;  %v494_v24 = vadd.s32 56, %v942_v48 }
 0x1cd   :  { %vm512_vm11 = vcmp.ge.s32.totalorder %v494_v24, %v947_v50 }
 0x1d0   :  { %v429_v25 = vpop.f32.mrf.mxu2 }
 0x1d1   :  { %v430_v26 = vadd.f32 %v785_v11, %v429_v25 }
 0x1d3   :  { %460 = vxpose.xlu0.b32.cont [7/16] %v430_v26, 128  ;;  %v490_v26 = vadd.s32 24, %v942_v48 }
 0x1d5   :  { %vm508_vm12 = vcmp.ge.s32.totalorder %v490_v26, %v947_v50 }
 0x1d8   :  { %v431_v27 = vpop.f32.mrf.mxu2 }
 0x1d9   :  { %v432_v28 = vadd.f32 %v785_v11, %v431_v27  ;;  %v497_v27 = vadd.s32 80, %v942_v48 }
 0x1db   :  { %461 = vxpose.xlu0.b32.cont [8/16] %v432_v28, 128  ;;  %v498_v28 = vadd.s32 88, %v942_v48  ;;  %vm515_vm13 = vcmp.ge.s32.totalorder %v497_v27, %v947_v50 }
 0x1dd   :  { %vm516_vm14 = vcmp.ge.s32.totalorder %v498_v28, %v947_v50 }
 0x1e0   :  { %v434_v29 = vpop.f32.mrf.mxu2 }
 0x1e1   :  { %v435_v18 = vadd.f32 %v785_v11, %v434_v29 }
 0x1e3   :  { %462 = vxpose.xlu0.b32.cont [9/16] %v435_v18, 128  ;;  %v501_v18 = vadd.s32 112, %v942_v48 }
 0x1e5   :  { %vm519_vm15 = vcmp.ge.s32.totalorder %v501_v18, %v947_v50 }
 0x1e8   :  { %v436_v30 = vpop.f32.mrf.mxu2 }
 0x1e9   :  { %v437_v31 = vadd.f32 %v785_v11, %v436_v30  ;;  %v502_v30 = vadd.s32 120, %v942_v48 }
 0x1eb   :  { %463 = vxpose.xlu0.b32.cont [10/16] %v437_v31, 128  ;;  %vm520_vm0 = vcmp.ge.s32.totalorder %v502_v30, %v947_v50 }
 0x1f0   :  { %v439_v32 = vpop.f32.mrf.mxu2 }
 0x1f1   :  { %v440_v33 = vadd.f32 %v785_v11, %v439_v32 }
 0x1f3   :  { %464 = vxpose.xlu0.b32.cont [11/16] %v440_v33, 128 }
 0x1f8   :  { %v441_v34 = vpop.f32.mrf.mxu2 }
 0x1f9   :  { %v442_v35 = vadd.f32 %v785_v11, %v441_v34 }
 0x1fb   :  { %465 = vxpose.xlu0.b32.cont [12/16] %v442_v35, 128 }
 0x206   :  { %v444_v36 = vpop.f32.mrf.mxu3 }
 0x207   :  { %v445_v37 = vadd.f32 %v785_v11, %v444_v36 }
 0x209   :  { %466 = vxpose.xlu0.b32.cont [13/16] %v445_v37, 128 }
 0x20e   :  { %v446_v38 = vpop.f32.mrf.mxu3 }
 0x20f   :  { %v447_v39 = vadd.f32 %v785_v11, %v446_v38 }
 0x211   :  { %467 = vxpose.xlu0.b32.cont [14/16] %v447_v39, 128 }
 0x216   :  { %v449_v40 = vpop.f32.mrf.mxu3 }
 0x217   :  { %v450_v41 = vadd.f32 %v785_v11, %v449_v40 }
 0x219   :  { %468 = vxpose.xlu0.b32.cont [15/16] %v450_v41, 128 }
 0x21e   :  { %v451_v42 = vpop.f32.mrf.mxu3 }
 0x21f   :  { %v452_v43 = vadd.f32 %v785_v11, %v451_v42 }
 0x221   :  { %469 = vxpose.xlu0.b32.end [16/16] %v452_v43, 128 }
 0x24d   :  { %v470_v44 = vpop.trf.xlu0 }
 0x24e   :  { %v956_v53 = vsel %vm505_vm1, -1e+11, %v470_v44 }
 0x255   :  { %v471_v45 = vpop.trf.xlu0 }
 0x256   :  { %v972_v59 = vsel %vm506_vm3, -1e+11, %v471_v45 }
 0x25d   :  { %v472_v46 = vpop.trf.xlu0 }
 0x25e   :  { %v988_v1 = vsel %vm507_vm5, -1e+11, %v472_v46 }
 0x265   :  { %v473_v49 = vpop.trf.xlu0 }
 0x266   :  { %v524_v32 = vsel %vm508_vm12, -1e+11, %v473_v49 }
 0x26d   :  { %v474_v52 = vpop.trf.xlu0 }
 0x26e   :  { %v958_v54 = vsel %vm509_vm2, -1e+11, %v474_v52 }
 0x26f   :  { %v537_v56 = vmax.f32 %v956_v53, %v958_v54 }
 0x275   :  { %v475_v58 = vpop.trf.xlu0 }
 0x276   :  { %v974_v60 = vsel %vm510_vm4, -1e+11, %v475_v58 }
 0x277   :  { %v538_v62 = vmax.f32 %v972_v59, %v974_v60 }
 0x27d   :  { %v476_v0 = vpop.trf.xlu0 }
 0x27e   :  { %v990_v2 = vsel %vm511_vm6, -1e+11, %v476_v0 }
 0x27f   :  { %v539_v3 = vmax.f32 %v988_v1, %v990_v2 }
 0x285   :  { %v477_v4 = vpop.trf.xlu0 }
 0x286   :  { %v528_v31 = vsel %vm512_vm11, -1e+11, %v477_v4 }
 0x287   :  { %v540_v35 = vmax.f32 %v524_v32, %v528_v31 }
 0x28d   :  { %v478_v5 = vpop.trf.xlu0 }
 0x28e   :  { %v1012_v14 = vsel %vm513_vm7, -1e+11, %v478_v5 }
 0x28f   :  { %v541_v17 = vmax.f32 %v537_v56, %v1012_v14 }
 0x295   :  { %v479_v6 = vpop.trf.xlu0 }
 0x296   :  { %v1014_v15 = vsel %vm514_vm8, -1e+11, %v479_v6 }
 0x297   :  { %v542_v19 = vmax.f32 %v538_v62, %v1014_v15 }
 0x29d   :  { %v480_v7 = vpop.trf.xlu0 }
 0x29e   :  { %v531_v33 = vsel %vm515_vm13, -1e+11, %v480_v7 }
 0x29f   :  { %v543_v37 = vmax.f32 %v539_v3, %v531_v33 }
 0x2a5   :  { %v481_v8 = vpop.trf.xlu0 }
 0x2a6   :  { %v532_v34 = vsel %vm516_vm14, -1e+11, %v481_v8 }
 0x2a7   :  { %v544_v38 = vmax.f32 %v540_v35, %v532_v34 }
 0x2ad   :  { %v482_v11 = vpop.trf.xlu0 }
 0x2ae   :  { %v1018_v16 = vsel %vm517_vm9, -1e+11, %v482_v11 }
 0x2af   :  { %v545_v22 = vmax.f32 %v541_v17, %v1018_v16 }
 0x2b5   :  { %v483_v21 = vpop.trf.xlu0 }
 0x2b6   :  { %v1022_v20 = vsel %vm518_vm10, -1e+11, %v483_v21 }
 0x2b7   :  { %v546_v23 = vmax.f32 %v542_v19, %v1022_v20 }
 0x2b9   :  { %v549_v25 = vmax.f32 %v545_v22, %v546_v23 }
 0x2bd   :  { %v484_v29 = vpop.trf.xlu0 }
 0x2be   :  { %v535_v36 = vsel %vm519_vm15, -1e+11, %v484_v29 }
 0x2bf   :  { %v547_v41 = vmax.f32 %v543_v37, %v535_v36 }
 0x2c5   :  { %v485_v39 = vpop.trf.xlu0 }
 0x2c6   :  { %v536_v40 = vsel %vm520_vm0, -1e+11, %v485_v39 }
 0x2c7   :  { %v548_v42 = vmax.f32 %v544_v38, %v536_v40 }
 0x2c9   :  { %v550_v43 = vmax.f32 %v547_v41, %v548_v42 }
 0x2cb   :  { %v551_v44 = vmax.f32 %v549_v25, %v550_v43 }
 0x2cd   :  { %v552_v45 = vrot.slane %v551_v44, 4 }
 0x2cf   :  { %v553_v46 = vmax.f32 %v551_v44, %v552_v45 }
 0x2d1   :  { %v554_v47 = vrot.slane %v553_v46, 2 }
 0x2d3   :  { %v555_v52 = vmax.f32 %v553_v46, %v554_v47 }
 0x2d5   :  { %v556_v56 = vrot.slane %v555_v52, 1 }
 0x2d7   :  { %v557_v49 = vmax.f32 %v555_v52, %v556_v56 }
 0x2d9   :  { %vm558_vm1 = vcmp.eq.f32.partialorder %v956_v53, %v557_v49  ;;  %vm559_vm2 = vcmp.eq.f32.partialorder %v972_v59, %v557_v49  ;;  %vm560_vm3 = vcmp.eq.f32.partialorder %v988_v1, %v557_v49  ;;  %vm561_vm4 = vcmp.eq.f32.partialorder %v524_v32, %v557_v49 }
 0x2da   :  { %vm562_vm5 = vcmp.eq.f32.partialorder %v958_v54, %v557_v49  ;;  %vm563_vm6 = vcmp.eq.f32.partialorder %v974_v60, %v557_v49  ;;  %vm564_vm7 = vcmp.eq.f32.partialorder %v990_v2, %v557_v49  ;;  %vm565_vm8 = vcmp.eq.f32.partialorder %v528_v31, %v557_v49 }
 0x2db   :  { %vm566_vm9 = vcmp.eq.f32.partialorder %v1012_v14, %v557_v49  ;;  %vm567_vm10 = vcmp.eq.f32.partialorder %v1014_v15, %v557_v49  ;;  %vm568_vm11 = vcmp.eq.f32.partialorder %v531_v33, %v557_v49  ;;  %vm569_vm12 = vcmp.eq.f32.partialorder %v532_v34, %v557_v49 }
 0x2dc   :  { %vm570_vm13 = vcmp.eq.f32.partialorder %v1018_v16, %v557_v49  ;;  %vm571_vm14 = vcmp.eq.f32.partialorder %v1022_v20, %v557_v49  ;;  %vm572_vm15 = vcmp.eq.f32.partialorder %v535_v36, %v557_v49  ;;  %vm573_vm0 = vcmp.eq.f32.partialorder %v536_v40, %v557_v49 }
 0x2dd   :  { %v574_v50 = vsel %vm558_vm1, %v942_v48, 128  ;;  %v575_v58 = vsel %vm559_vm2, %v961_v55, 128  ;;  %v576_v62 = vsel %vm560_vm3, %v977_v61, 128  ;;  %v577_v0 = vsel %vm561_vm4, %v490_v26, 128 }
 0x2de   :  { %v578_v3 = vsel %vm562_vm5, %v950_v51, 128  ;;  %v579_v4 = vsel %vm563_vm6, %v966_v57, 128  ;;  %v580_v48 = vsel %vm564_vm7, %v982_v63, 128  ;;  %v581_v53 = vsel %vm565_vm8, %v494_v24, 128 }
 0x2df   :  { %v582_v55 = vsel %vm566_vm9, %v995_v9, 128  ;;  %v583_v59 = vsel %vm567_vm10, %v998_v10, 128  ;;  %v584_v51 = vsel %vm568_vm11, %v497_v27, 128  ;;  %v585_v54 = vsel %vm569_vm12, %v498_v28, 128 }
 0x2e0   :  { %v586_v57 = vsel %vm570_vm13, %v1001_v12, 128  ;;  %v587_v60 = vsel %vm571_vm14, %v1008_v13, 128  ;;  %v588_v61 = vsel %vm572_vm15, %v501_v18, 128  ;;  %v589_v63 = vsel %vm573_vm0, %v502_v30, 128 }
 0x2e1   :  { %vm590_vm1 = vcmp.lt.s32.totalorder %v574_v50, %v578_v3  ;;  %vm592_vm2 = vcmp.lt.s32.totalorder %v575_v58, %v579_v4  ;;  %vm594_vm3 = vcmp.lt.s32.totalorder %v576_v62, %v580_v48  ;;  %vm596_vm4 = vcmp.lt.s32.totalorder %v577_v0, %v581_v53 }
 0x2e2   :  { %v591_v1 = vsel %vm590_vm1, %v574_v50, %v578_v3  ;;  %v593_v2 = vsel %vm592_vm2, %v575_v58, %v579_v4  ;;  %v595_v5 = vsel %vm594_vm3, %v576_v62, %v580_v48  ;;  %v597_v6 = vsel %vm596_vm4, %v577_v0, %v581_v53 }
 0x2e3   :  { %vm598_vm5 = vcmp.lt.s32.totalorder %v591_v1, %v582_v55  ;;  %vm600_vm6 = vcmp.lt.s32.totalorder %v593_v2, %v583_v59  ;;  %vm602_vm7 = vcmp.lt.s32.totalorder %v595_v5, %v584_v51  ;;  %vm604_vm8 = vcmp.lt.s32.totalorder %v597_v6, %v585_v54 }
 0x2e4   :  { %v599_v7 = vsel %vm598_vm5, %v591_v1, %v582_v55  ;;  %v601_v8 = vsel %vm600_vm6, %v593_v2, %v583_v59  ;;  %v603_v9 = vsel %vm602_vm7, %v595_v5, %v584_v51  ;;  %v605_v10 = vsel %vm604_vm8, %v597_v6, %v585_v54 }
 0x2e5   :  { %vm606_vm9 = vcmp.lt.s32.totalorder %v599_v7, %v586_v57  ;;  %vm608_vm10 = vcmp.lt.s32.totalorder %v601_v8, %v587_v60  ;;  %vm610_vm11 = vcmp.lt.s32.totalorder %v603_v9, %v588_v61  ;;  %vm612_vm12 = vcmp.lt.s32.totalorder %v605_v10, %v589_v63 }
 0x2e6   :  { %v607_v11 = vsel %vm606_vm9, %v599_v7, %v586_v57  ;;  %v609_v12 = vsel %vm608_vm10, %v601_v8, %v587_v60  ;;  %v611_v13 = vsel %vm610_vm11, %v603_v9, %v588_v61  ;;  %v613_v14 = vsel %vm612_vm12, %v605_v10, %v589_v63 }
 0x2e7   :  { %vm614_vm13 = vcmp.lt.s32.totalorder %v607_v11, %v609_v12  ;;  %vm616_vm14 = vcmp.lt.s32.totalorder %v611_v13, %v613_v14 }
 0x2e8   :  { %v615_v15 = vsel %vm614_vm13, %v607_v11, %v609_v12  ;;  %v617_v16 = vsel %vm616_vm14, %v611_v13, %v613_v14 }
 0x2e9   :  { %vm618_vm15 = vcmp.lt.s32.totalorder %v615_v15, %v617_v16 }
 0x2ea   :  { %v619_v17 = vsel %vm618_vm15, %v615_v15, %v617_v16 }
 0x2eb   :  { %v620_v19 = vrot.slane %v619_v17, 4 }
 0x2ed   :  { %vm621_vm0 = vcmp.lt.s32.totalorder %v619_v17, %v620_v19 }
 0x2ee   :  { %v622_v21 = vsel %vm621_vm0, %v619_v17, %v620_v19 }
 0x2ef   :  { %v623_v20 = vrot.slane %v622_v21, 2 }
 0x2f1   :  { %vm624_vm1 = vcmp.lt.s32.totalorder %v622_v21, %v623_v20 }
 0x2f2   :  { %v625_v22 = vsel %vm624_vm1, %v622_v21, %v623_v20 }
 0x2f3   :  { %v626_v23 = vrot.slane %v625_v22, 1 }
 0x2f5   :  { %vm627_vm2 = vcmp.lt.s32.totalorder %v625_v22, %v626_v23 }
 0x2f6   :  { %v628_v24 = vsel %vm627_vm2, %v625_v22, %v626_v23 }
 0x2f7   :  { %629 = vst [vmem:[%s1095_s8] sm:$0x1] %v628_v24 }

// kernel: dqn_predict.1
= control target key start
LH: loop header
LB: loop body
LE: loop exit
PB: predicated region body
PF: predicated region fallthrough
CT: control target
= control target key end

     0   :  { %vm98_vm0 = vcmask 130048   ;;  %s1087_s2 = inlined_call_operand.vmem [shape: bf16[16,128], index: 2, kind: input, shape index: {}]   ;;  %s1088_s0 = inlined_call_operand.vmem [shape: bf16[128,16], index: 0, kind: input, shape index: {}]   ;;  %s1089_s3 = inlined_call_operand.vmem [shape: f32[1,128], index: 3, kind: input, shape index: {}]   ;;  %s1090_s4 = inlined_call_operand.vmem [shape: bf16[128,128], index: 4, kind: input, shape index: {}]   ;;  %s1091_s5 = inlined_call_operand.vmem [shape: f32[1,128], index: 5, kind: input, shape index: {}]   ;;  %s1092_s6 = inlined_call_operand.vmem [shape: bf16[128,128], index: 6, kind: input, shape index: {}]   ;;  %s1093_s7 = inlined_call_operand.vmem [shape: f32[1,128], index: 7, kind: input, shape index: {}]   ;;  %s1094_s1 = inlined_call_operand.vmem [shape: s32[1,128], index: 1, kind: input, shape index: {}]   ;;  %s1095_s8 = inlined_call_operand.vmem [shape: s32[1,128], index: 8, kind: output, shape index: {}]  }
   0x1   :  { %v750_v0 = vld [vmem:[%s1087_s2] sm:$0xff]  ;;  %v743_v2 = vld [vmem:[%s1088_s0 + $0x8] sm:$0xff]  ;;  %v744_v3 = vld [vmem:[%s1088_s0 + $0x10] sm:$0xff] }
   0x2   :  { %v742_v1 = vld [vmem:[%s1088_s0] sm:$0xff]  ;;  %130 = vmatpush.bf16.msra.mxu0 %v750_v0  ;;  %v745_v4 = vld [vmem:[%s1088_s0 + $0x18] sm:$0xff]  ;;  %v747_v7 = vld [vmem:[%s1088_s0 + $0x28] sm:$0xff] }
   0x3   :  { %v746_v5 = vld [vmem:[%s1088_s0 + $0x20] sm:$0xff]  ;;  %v758_v6 = vld [vmem:[%s1090_s4 + $0x38] sm:$0xff]  ;;  %v757_v8 = vld [vmem:[%s1090_s4 + $0x30] sm:$0xff] }
   0x4   :  { %264 = vmatpush.bf16.msra.mxu1 %v758_v6  ;;  %767 = vmatpush.bf16.msra.mxu3 %v758_v6  ;;  %v756_v9 = vld [vmem:[%s1090_s4 + $0x28] sm:$0xff]  ;;  %v755_v10 = vld [vmem:[%s1090_s4 + $0x20] sm:$0xff]  ;;  %v754_v11 = vld [vmem:[%s1090_s4 + $0x18] sm:$0xff] }
   0x5   :  { %670 = vmatmul.msk.bf16.vlgmr.msra.gmra.mxu0 %vm98_vm0, %v742_v1  ;;  %v748_v12 = vld [vmem:[%s1088_s0 + $0x30] sm:$0xff]  ;;  %v752_v14 = vld [vmem:[%s1090_s4 + $0x8] sm:$0xff]  ;;  %v751_v15 = vld [vmem:[%s1090_s4] sm:$0xff] }
   0x6   :  { %v753_v13 = vld [vmem:[%s1090_s4 + $0x10] sm:$0xff]  ;;  %v749_v16 = vld [vmem:[%s1088_s0 + $0x38] sm:$0xff]  ;;  %v894_v18 = vld [vmem:[%s1089_s3] ss:$0 sm:$0xff] }
   0x7   :  { %v766_v57 = vld [vmem:[%s1092_s6 + $0x38] sm:$0xff]  ;;  %v765_v61 = vld [vmem:[%s1092_s6 + $0x30] sm:$0xff]  ;;  %v764_v63 = vld [vmem:[%s1092_s6 + $0x28] sm:$0xff] }
   0x8   :  { %265 = vmatpush.bf16.msra.mxu1 %v757_v8  ;;  %768 = vmatpush.bf16.msra.mxu3 %v757_v8  ;;  %v763_v0 = vld [vmem:[%s1092_s6 + $0x20] sm:$0xff]  ;;  %v761_v8 = vld [vmem:[%s1092_s6 + $0x10] sm:$0xff] }
   0x9   :  { %405 = vmatpush.bf16.msra.mxu2 %v766_v57 }
   0xc   :  { %266 = vmatpush.bf16.msra.mxu1 %v756_v9  ;;  %769 = vmatpush.bf16.msra.mxu3 %v756_v9 }
   0xd   :  { %406 = vmatpush.bf16.msra.mxu2 %v765_v61 }
  0x10   :  { %267 = vmatpush.bf16.msra.mxu1 %v755_v10  ;;  %770 = vmatpush.bf16.msra.mxu3 %v755_v10  ;;  %v760_v10 = vld [vmem:[%s1092_s6 + $0x8] sm:$0xff] }
  0x11   :  { %407 = vmatpush.bf16.msra.mxu2 %v764_v63 }
  0x14   :  { %268 = vmatpush.bf16.msra.mxu1 %v754_v11  ;;  %771 = vmatpush.bf16.msra.mxu3 %v754_v11  ;;  %v759_v11 = vld [vmem:[%s1092_s6] sm:$0xff] }
  0x15   :  { %671 = vmatmul.msk.bf16.gmra.mxu0 %vm98_vm0, %v743_v2  ;;  %408 = vmatpush.bf16.msra.mxu2 %v763_v0 }
  0x18   :  { %269 = vmatpush.bf16.msra.mxu1 %v753_v13  ;;  %772 = vmatpush.bf16.msra.mxu3 %v753_v13 }
  0x1c   :  { %270 = vmatpush.bf16.msra.mxu1 %v752_v14  ;;  %773 = vmatpush.bf16.msra.mxu3 %v752_v14 }
  0x20   :  { %271 = vmatpush.bf16.msra.mxu1 %v751_v15  ;;  %774 = vmatpush.bf16.msra.mxu3 %v751_v15 }
  0x24   :  { %775 = vmatpush.bf16.msrb.mxu3 %v766_v57 }
  0x25   :  { %672 = vmatmul.msk.bf16.gmra.mxu0 %vm98_vm0, %v744_v3 }
  0x28   :  { %776 = vmatpush.bf16.msrb.mxu3 %v765_v61 }
  0x2c   :  { %777 = vmatpush.bf16.msrb.mxu3 %v764_v63 }
  0x30   :  { %778 = vmatpush.bf16.msrb.mxu3 %v763_v0 }
  0x35   :  { %673 = vmatmul.msk.bf16.gmra.mxu0 %vm98_vm0, %v745_v4  ;;  %v762_v4 = vld [vmem:[%s1092_s6 + $0x18] sm:$0xff] }
  0x36   :  { %409 = vmatpush.bf16.msra.mxu2 %v762_v4  ;;  %779 = vmatpush.bf16.msrb.mxu3 %v762_v4 }
  0x3a   :  { %410 = vmatpush.bf16.msra.mxu2 %v761_v8  ;;  %780 = vmatpush.bf16.msrb.mxu3 %v761_v8 }
  0x3e   :  { %411 = vmatpush.bf16.msra.mxu2 %v760_v10  ;;  %781 = vmatpush.bf16.msrb.mxu3 %v760_v10 }
  0x42   :  { %412 = vmatpush.bf16.msra.mxu2 %v759_v11  ;;  %782 = vmatpush.bf16.msrb.mxu3 %v759_v11  ;;  %v785_v11 = vld [vmem:[%s1093_s7] ss:$0 sm:$0xff] }
  0x45   :  { %674 = vmatmul.msk.bf16.gmra.mxu0 %vm98_vm0, %v746_v5 }
  0x55   :  { %675 = vmatmul.msk.bf16.gmra.mxu0 %vm98_vm0, %v747_v7 }
  0x65   :  { %676 = vmatmul.msk.bf16.gmra.mxu0 %vm98_vm0, %v748_v12 }
  0x75   :  { %677 = vmatmul.msk.bf16.gmra.mxu0 %vm98_vm0, %v749_v16 }
  0x82   :  { %v132_v17 = vpop.f32.mrf.mxu0 }
  0x83   :  { %v133_v19 = vadd.f32 %v894_v18, %v132_v17 }
  0x85   :  { %v172_v22 = vmax.f32 %v133_v19, 0.0 }
  0x8a   :  { %v134_v20 = vpop.f32.mrf.mxu0 }
  0x8b   :  { %v135_v21 = vadd.f32 %v894_v18, %v134_v20  ;;  %v784_v20 = vld [vmem:[%s1091_s5] ss:$0 sm:$0xff] }
  0x8d   :  { %v173_v23 = vmax.f32 %v135_v21, 0.0 }
  0x8f   :  { %v188_v24 = vpack.c.bf16 %v173_v23, %v172_v22 }
  0x91   :  { %272 = vmatmul.bf16.vlgmr.msra.gmra.mxu1 %v188_v24 }
  0x92   :  { %v137_v25 = vpop.f32.mrf.mxu0 }
  0x93   :  { %v138_v26 = vadd.f32 %v894_v18, %v137_v25 }
  0x95   :  { %v174_v29 = vmax.f32 %v138_v26, 0.0 }
  0x9a   :  { %v139_v27 = vpop.f32.mrf.mxu0 }
  0x9b   :  { %v140_v28 = vadd.f32 %v894_v18, %v139_v27 }
  0x9d   :  { %v175_v30 = vmax.f32 %v140_v28, 0.0 }
  0x9f   :  { %v189_v31 = vpack.c.bf16 %v175_v30, %v174_v29 }
  0xa1   :  { %277 = vmatmul.bf16.gmra.mxu1 %v189_v31 }
  0xa2   :  { %v142_v32 = vpop.f32.mrf.mxu0 }
  0xa3   :  { %v143_v33 = vadd.f32 %v894_v18, %v142_v32 }
  0xa5   :  { %v176_v36 = vmax.f32 %v143_v33, 0.0 }
  0xaa   :  { %v144_v34 = vpop.f32.mrf.mxu0 }
  0xab   :  { %v145_v35 = vadd.f32 %v894_v18, %v144_v34 }
  0xad   :  { %v177_v37 = vmax.f32 %v145_v35, 0.0 }
  0xaf   :  { %v190_v38 = vpack.c.bf16 %v177_v37, %v176_v36 }
  0xb1   :  { %282 = vmatmul.bf16.gmra.mxu1 %v190_v38 }
  0xb2   :  { %v147_v39 = vpop.f32.mrf.mxu0 }
  0xb3   :  { %v148_v40 = vadd.f32 %v894_v18, %v147_v39 }
  0xb5   :  { %v178_v43 = vmax.f32 %v148_v40, 0.0 }
  0xba   :  { %v149_v41 = vpop.f32.mrf.mxu0 }
  0xbb   :  { %v150_v42 = vadd.f32 %v894_v18, %v149_v41 }
  0xbd   :  { %v179_v44 = vmax.f32 %v150_v42, 0.0 }
  0xbf   :  { %v191_v45 = vpack.c.bf16 %v179_v44, %v178_v43 }
  0xc1   :  { %287 = vmatmul.bf16.gmra.mxu1 %v191_v45 }
  0xc2   :  { %v152_v46 = vpop.f32.mrf.mxu0 }
  0xc3   :  { %v153_v47 = vadd.f32 %v894_v18, %v152_v46 }
  0xc5   :  { %v180_v50 = vmax.f32 %v153_v47, 0.0 }
  0xca   :  { %v154_v48 = vpop.f32.mrf.mxu0 }
  0xcb   :  { %v155_v49 = vadd.f32 %v894_v18, %v154_v48 }
  0xcd   :  { %v181_v51 = vmax.f32 %v155_v49, 0.0 }
  0xcf   :  { %v192_v52 = vpack.c.bf16 %v181_v51, %v180_v50 }
  0xd1   :  { %292 = vmatmul.bf16.gmra.mxu1 %v192_v52 }
  0xd2   :  { %v157_v53 = vpop.f32.mrf.mxu0 }
  0xd3   :  { %v158_v54 = vadd.f32 %v894_v18, %v157_v53 }
  0xd5   :  { %v182_v58 = vmax.f32 %v158_v54, 0.0 }
  0xda   :  { %v159_v55 = vpop.f32.mrf.mxu0 }
  0xdb   :  { %v160_v56 = vadd.f32 %v894_v18, %v159_v55 }
  0xdd   :  { %v183_v59 = vmax.f32 %v160_v56, 0.0 }
  0xdf   :  { %v193_v60 = vpack.c.bf16 %v183_v59, %v182_v58 }
  0xe1   :  { %297 = vmatmul.bf16.gmra.mxu1 %v193_v60 }
  0xe2   :  { %v162_v62 = vpop.f32.mrf.mxu0 }
  0xe3   :  { %v163_v1 = vadd.f32 %v894_v18, %v162_v62 }
  0xe5   :  { %v184_v5 = vmax.f32 %v163_v1, 0.0 }
  0xea   :  { %v164_v2 = vpop.f32.mrf.mxu0 }
  0xeb   :  { %v165_v3 = vadd.f32 %v894_v18, %v164_v2 }
  0xed   :  { %v185_v6 = vmax.f32 %v165_v3, 0.0 }
  0xef   :  { %v194_v7 = vpack.c.bf16 %v185_v6, %v184_v5 }
  0xf1   :  { %302 = vmatmul.bf16.vlgmr.msra.gmra.mxu3 %v194_v7 }
  0xf2   :  { %v167_v9 = vpop.f32.mrf.mxu0 }
  0xf3   :  { %v168_v12 = vadd.f32 %v894_v18, %v167_v9 }
  0xf5   :  { %v186_v15 = vmax.f32 %v168_v12, 0.0 }
  0xfa   :  { %v169_v13 = vpop.f32.mrf.mxu0 }
  0xfb   :  { %v170_v14 = vadd.f32 %v894_v18, %v169_v13 }
  0xfd   :  { %v187_v16 = vmax.f32 %v170_v14, 0.0 }
  0xff   :  { %v195_v17 = vpack.c.bf16 %v187_v16, %v186_v15 }
 0x101   :  { %307 = vmatmul.bf16.gmra.mxu3 %v195_v17 }
 0x10e   :  { %v273_v19 = vpop.f32.mrf.mxu1 }
 0x10f   :  { %v274_v21 = vadd.f32 %v784_v20, %v273_v19 }
 0x111   :  { %v313_v24 = vmax.f32 %v274_v21, 0.0 }
 0x116   :  { %v275_v22 = vpop.f32.mrf.mxu1 }
 0x117   :  { %v276_v23 = vadd.f32 %v784_v20, %v275_v22 }
 0x119   :  { %v314_v25 = vmax.f32 %v276_v23, 0.0 }
 0x11b   :  { %v329_v26 = vpack.c.bf16 %v314_v25, %v313_v24 }
 0x11d   :  { %413 = vmatmul.bf16.vlgmr.msra.gmra.mxu2 %v329_v26 }
 0x11e   :  { %v278_v27 = vpop.f32.mrf.mxu1 }
 0x11f   :  { %v279_v28 = vadd.f32 %v784_v20, %v278_v27 }
 0x121   :  { %v315_v30 = vmax.f32 %v279_v28, 0.0 }
 0x126   :  { %v280_v29 = vpop.f32.mrf.mxu1 }
 0x127   :  { %v281_v18 = vadd.f32 %v784_v20, %v280_v29 }
 0x129   :  { %v316_v31 = vmax.f32 %v281_v18, 0.0 }
 0x12b   :  { %v330_v32 = vpack.c.bf16 %v316_v31, %v315_v30 }
 0x12d   :  { %418 = vmatmul.bf16.gmra.mxu2 %v330_v32 }
 0x12e   :  { %v283_v33 = vpop.f32.mrf.mxu1 }
 0x12f   :  { %v284_v34 = vadd.f32 %v784_v20, %v283_v33 }
 0x131   :  { %v317_v37 = vmax.f32 %v284_v34, 0.0 }
 0x136   :  { %v285_v35 = vpop.f32.mrf.mxu1 }
 0x137   :  { %v286_v36 = vadd.f32 %v784_v20, %v285_v35 }
 0x139   :  { %v318_v38 = vmax.f32 %v286_v36, 0.0 }
 0x13b   :  { %v331_v39 = vpack.c.bf16 %v318_v38, %v317_v37 }
 0x13d   :  { %423 = vmatmul.bf16.gmra.mxu2 %v331_v39 }
 0x13e   :  { %v288_v40 = vpop.f32.mrf.mxu1 }
 0x13f   :  { %v289_v41 = vadd.f32 %v784_v20, %v288_v40 }
 0x141   :  { %v319_v44 = vmax.f32 %v289_v41, 0.0 }
 0x146   :  { %v290_v42 = vpop.f32.mrf.mxu1 }
 0x147   :  { %v291_v43 = vadd.f32 %v784_v20, %v290_v42 }
 0x149   :  { %v320_v45 = vmax.f32 %v291_v43, 0.0 }
 0x14b   :  { %v332_v46 = vpack.c.bf16 %v320_v45, %v319_v44 }
 0x14d   :  { %428 = vmatmul.bf16.gmra.mxu2 %v332_v46 }
 0x14e   :  { %v293_v47 = vpop.f32.mrf.mxu1 }
 0x14f   :  { %v294_v48 = vadd.f32 %v784_v20, %v293_v47  ;;  %v486_v47 = vlaneseq }
 0x151   :  { %v321_v51 = vmax.f32 %v294_v48, 0.0  ;;  %v942_v48 = vshrl.u32 %v486_v47, 7 }
 0x156   :  { %v295_v49 = vpop.f32.mrf.mxu1 }
 0x157   :  { %v296_v50 = vadd.f32 %v784_v20, %v295_v49 }
 0x159   :  { %v322_v52 = vmax.f32 %v296_v50, 0.0  ;;  %v947_v50 = vld [vmem:[%s1094_s1] ss:$0 sm:$0xff] }
 0x15a   :  { %vm505_vm1 = vcmp.ge.s32.totalorder %v942_v48, %v947_v50 }
 0x15b   :  { %v333_v53 = vpack.c.bf16 %v322_v52, %v321_v51  ;;  %v950_v51 = vadd.s32 32, %v942_v48 }
 0x15d   :  { %433 = vmatmul.bf16.gmra.mxu2 %v333_v53  ;;  %vm509_vm2 = vcmp.ge.s32.totalorder %v950_v51, %v947_v50 }
 0x15e   :  { %v298_v54 = vpop.f32.mrf.mxu1 }
 0x15f   :  { %v299_v55 = vadd.f32 %v784_v20, %v298_v54 }
 0x161   :  { %v323_v58 = vmax.f32 %v299_v55, 0.0  ;;  %v961_v55 = vadd.s32 8, %v942_v48 }
 0x163   :  { %vm506_vm3 = vcmp.ge.s32.totalorder %v961_v55, %v947_v50 }
 0x166   :  { %v300_v56 = vpop.f32.mrf.mxu1 }
 0x167   :  { %v301_v57 = vadd.f32 %v784_v20, %v300_v56 }
 0x169   :  { %v324_v59 = vmax.f32 %v301_v57, 0.0  ;;  %v966_v57 = vadd.s32 40, %v942_v48 }
 0x16b   :  { %v334_v60 = vpack.c.bf16 %v324_v59, %v323_v58  ;;  %vm510_vm4 = vcmp.ge.s32.totalorder %v966_v57, %v947_v50 }
 0x16d   :  { %438 = vmatmul.bf16.gmra.mxu2 %v334_v60 }
 0x174   :  { %v303_v61 = vpop.f32.mrf.mxu3 }
 0x175   :  { %v304_v62 = vadd.f32 %v784_v20, %v303_v61  ;;  %v977_v61 = vadd.s32 16, %v942_v48 }
 0x177   :  { %v325_v1 = vmax.f32 %v304_v62, 0.0  ;;  %vm507_vm5 = vcmp.ge.s32.totalorder %v977_v61, %v947_v50 }
 0x17c   :  { %v305_v63 = vpop.f32.mrf.mxu3 }
 0x17d   :  { %v306_v0 = vadd.f32 %v784_v20, %v305_v63  ;;  %v982_v63 = vadd.s32 48, %v942_v48 }
 0x17f   :  { %v326_v2 = vmax.f32 %v306_v0, 0.0  ;;  %vm511_vm6 = vcmp.ge.s32.totalorder %v982_v63, %v947_v50 }
 0x181   :  { %v335_v3 = vpack.c.bf16 %v326_v2, %v325_v1 }
 0x183   :  { %443 = vmatmul.bf16.vlgmr.msrb.gmra.mxu3 %v335_v3 }
 0x184   :  { %v308_v4 = vpop.f32.mrf.mxu3 }
 0x185   :  { %v309_v5 = vadd.f32 %v784_v20, %v308_v4 }
 0x187   :  { %v327_v8 = vmax.f32 %v309_v5, 0.0 }
 0x18c   :  { %v310_v6 = vpop.f32.mrf.mxu3 }
 0x18d   :  { %v311_v7 = vadd.f32 %v784_v20, %v310_v6 }
 0x18f   :  { %v328_v9 = vmax.f32 %v311_v7, 0.0 }
 0x191   :  { %v336_v10 = vpack.c.bf16 %v328_v9, %v327_v8  ;;  %v995_v9 = vadd.s32 64, %v942_v48 }
 0x193   :  { %448 = vmatmul.bf16.gmra.mxu3 %v336_v10  ;;  %v998_v10 = vadd.s32 72, %v942_v48  ;;  %vm513_vm7 = vcmp.ge.s32.totalorder %v995_v9, %v947_v50 }
 0x195   :  { %vm514_vm8 = vcmp.ge.s32.totalorder %v998_v10, %v947_v50 }
 0x1a0   :  { %v414_v12 = vpop.f32.mrf.mxu2 }
 0x1a1   :  { %v415_v13 = vadd.f32 %v785_v11, %v414_v12  ;;  %v1001_v12 = vadd.s32 96, %v942_v48 }
 0x1a3   :  { %454 = vxpose.xlu0.b32.start [1/16] %v415_v13, 128  ;;  %v1008_v13 = vadd.s32 104, %v942_v48  ;;  %vm517_vm9 = vcmp.ge.s32.totalorder %v1001_v12, %v947_v50 }
 0x1a5   :  { %vm518_vm10 = vcmp.ge.s32.totalorder %v1008_v13, %v947_v50 }
 0x1a8   :  { %v416_v14 = vpop.f32.mrf.mxu2 }
 0x1a9   :  { %v417_v15 = vadd.f32 %v785_v11, %v416_v14 }
 0x1ab   :  { %455 = vxpose.xlu0.b32.cont [2/16] %v417_v15, 128 }
 0x1b0   :  { %v419_v16 = vpop.f32.mrf.mxu2 }
 0x1b1   :  { %v420_v17 = vadd.f32 %v785_v11, %v419_v16 }
 0x1b3   :  { %456 = vxpose.xlu0.b32.cont [3/16] %v420_v17, 128 }
 0x1b8   :  { %v421_v19 = vpop.f32.mrf.mxu2 }
 0x1b9   :  { %v422_v21 = vadd.f32 %v785_v11, %v421_v19 }
 0x1bb   :  { %457 = vxpose.xlu0.b32.cont [4/16] %v422_v21, 128 }
 0x1c0   :  { %v424_v20 = vpop.f32.mrf.mxu2 }
 0x1c1   :  { %v425_v22 = vadd.f32 %v785_v11, %v424_v20 }
 0x1c3   :  { %458 = vxpose.xlu0.b32.cont [5/16] %v425_v22, 128 }
 0x1c8   :  { %v426_v23 = vpop.f32.mrf.mxu2 }
 0x1c9   :  { %v427_v24 = vadd.f32 %v785_v11, %v426_v23 }
 0x1cb   :  { %459 = vxpose.xlu0.b32.cont [6/16] %v427_v24, 128  ;;  %v494_v24 = vadd.s32 56, %v942_v48 }
 0x1cd   :  { %vm512_vm11 = vcmp.ge.s32.totalorder %v494_v24, %v947_v50 }
 0x1d0   :  { %v429_v25 = vpop.f32.mrf.mxu2 }
 0x1d1   :  { %v430_v26 = vadd.f32 %v785_v11, %v429_v25 }
 0x1d3   :  { %460 = vxpose.xlu0.b32.cont [7/16] %v430_v26, 128  ;;  %v490_v26 = vadd.s32 24, %v942_v48 }
 0x1d5   :  { %vm508_vm12 = vcmp.ge.s32.totalorder %v490_v26, %v947_v50 }
 0x1d8   :  { %v431_v27 = vpop.f32.mrf.mxu2 }
 0x1d9   :  { %v432_v28 = vadd.f32 %v785_v11, %v431_v27  ;;  %v497_v27 = vadd.s32 80, %v942_v48 }
 0x1db   :  { %461 = vxpose.xlu0.b32.cont [8/16] %v432_v28, 128  ;;  %v498_v28 = vadd.s32 88, %v942_v48  ;;  %vm515_vm13 = vcmp.ge.s32.totalorder %v497_v27, %v947_v50 }
 0x1dd   :  { %vm516_vm14 = vcmp.ge.s32.totalorder %v498_v28, %v947_v50 }
 0x1e0   :  { %v434_v29 = vpop.f32.mrf.mxu2 }
 0x1e1   :  { %v435_v18 = vadd.f32 %v785_v11, %v434_v29 }
 0x1e3   :  { %462 = vxpose.xlu0.b32.cont [9/16] %v435_v18, 128  ;;  %v501_v18 = vadd.s32 112, %v942_v48 }
 0x1e5   :  { %vm519_vm15 = vcmp.ge.s32.totalorder %v501_v18, %v947_v50 }
 0x1e8   :  { %v436_v30 = vpop.f32.mrf.mxu2 }
 0x1e9   :  { %v437_v31 = vadd.f32 %v785_v11, %v436_v30  ;;  %v502_v30 = vadd.s32 120, %v942_v48 }
 0x1eb   :  { %463 = vxpose.xlu0.b32.cont [10/16] %v437_v31, 128  ;;  %vm520_vm0 = vcmp.ge.s32.totalorder %v502_v30, %v947_v50 }
 0x1f0   :  { %v439_v32 = vpop.f32.mrf.mxu2 }
 0x1f1   :  { %v440_v33 = vadd.f32 %v785_v11, %v439_v32 }
 0x1f3   :  { %464 = vxpose.xlu0.b32.cont [11/16] %v440_v33, 128 }
 0x1f8   :  { %v441_v34 = vpop.f32.mrf.mxu2 }
 0x1f9   :  { %v442_v35 = vadd.f32 %v785_v11, %v441_v34 }
 0x1fb   :  { %465 = vxpose.xlu0.b32.cont [12/16] %v442_v35, 128 }
 0x206   :  { %v444_v36 = vpop.f32.mrf.mxu3 }
 0x207   :  { %v445_v37 = vadd.f32 %v785_v11, %v444_v36 }
 0x209   :  { %466 = vxpose.xlu0.b32.cont [13/16] %v445_v37, 128 }
 0x20e   :  { %v446_v38 = vpop.f32.mrf.mxu3 }
 0x20f   :  { %v447_v39 = vadd.f32 %v785_v11, %v446_v38 }
 0x211   :  { %467 = vxpose.xlu0.b32.cont [14/16] %v447_v39, 128 }
 0x216   :  { %v449_v40 = vpop.f32.mrf.mxu3 }
 0x217   :  { %v450_v41 = vadd.f32 %v785_v11, %v449_v40 }
 0x219   :  { %468 = vxpose.xlu0.b32.cont [15/16] %v450_v41, 128 }
 0x21e   :  { %v451_v42 = vpop.f32.mrf.mxu3 }
 0x21f   :  { %v452_v43 = vadd.f32 %v785_v11, %v451_v42 }
 0x221   :  { %469 = vxpose.xlu0.b32.end [16/16] %v452_v43, 128 }
 0x24d   :  { %v470_v44 = vpop.trf.xlu0 }
 0x24e   :  { %v956_v53 = vsel %vm505_vm1, -1e+11, %v470_v44 }
 0x255   :  { %v471_v45 = vpop.trf.xlu0 }
 0x256   :  { %v972_v59 = vsel %vm506_vm3, -1e+11, %v471_v45 }
 0x25d   :  { %v472_v46 = vpop.trf.xlu0 }
 0x25e   :  { %v988_v1 = vsel %vm507_vm5, -1e+11, %v472_v46 }
 0x265   :  { %v473_v49 = vpop.trf.xlu0 }
 0x266   :  { %v524_v32 = vsel %vm508_vm12, -1e+11, %v473_v49 }
 0x26d   :  { %v474_v52 = vpop.trf.xlu0 }
 0x26e   :  { %v958_v54 = vsel %vm509_vm2, -1e+11, %v474_v52 }
 0x26f   :  { %v537_v56 = vmax.f32 %v956_v53, %v958_v54 }
 0x275   :  { %v475_v58 = vpop.trf.xlu0 }
 0x276   :  { %v974_v60 = vsel %vm510_vm4, -1e+11, %v475_v58 }
 0x277   :  { %v538_v62 = vmax.f32 %v972_v59, %v974_v60 }
 0x27d   :  { %v476_v0 = vpop.trf.xlu0 }
 0x27e   :  { %v990_v2 = vsel %vm511_vm6, -1e+11, %v476_v0 }
 0x27f   :  { %v539_v3 = vmax.f32 %v988_v1, %v990_v2 }
 0x285   :  { %v477_v4 = vpop.trf.xlu0 }
 0x286   :  { %v528_v31 = vsel %vm512_vm11, -1e+11, %v477_v4 }
 0x287   :  { %v540_v35 = vmax.f32 %v524_v32, %v528_v31 }
 0x28d   :  { %v478_v5 = vpop.trf.xlu0 }
 0x28e   :  { %v1012_v14 = vsel %vm513_vm7, -1e+11, %v478_v5 }
 0x28f   :  { %v541_v17 = vmax.f32 %v537_v56, %v1012_v14 }
 0x295   :  { %v479_v6 = vpop.trf.xlu0 }
 0x296   :  { %v1014_v15 = vsel %vm514_vm8, -1e+11, %v479_v6 }
 0x297   :  { %v542_v19 = vmax.f32 %v538_v62, %v1014_v15 }
 0x29d   :  { %v480_v7 = vpop.trf.xlu0 }
 0x29e   :  { %v531_v33 = vsel %vm515_vm13, -1e+11, %v480_v7 }
 0x29f   :  { %v543_v37 = vmax.f32 %v539_v3, %v531_v33 }
 0x2a5   :  { %v481_v8 = vpop.trf.xlu0 }
 0x2a6   :  { %v532_v34 = vsel %vm516_vm14, -1e+11, %v481_v8 }
 0x2a7   :  { %v544_v38 = vmax.f32 %v540_v35, %v532_v34 }
 0x2ad   :  { %v482_v11 = vpop.trf.xlu0 }
 0x2ae   :  { %v1018_v16 = vsel %vm517_vm9, -1e+11, %v482_v11 }
 0x2af   :  { %v545_v22 = vmax.f32 %v541_v17, %v1018_v16 }
 0x2b5   :  { %v483_v21 = vpop.trf.xlu0 }
 0x2b6   :  { %v1022_v20 = vsel %vm518_vm10, -1e+11, %v483_v21 }
 0x2b7   :  { %v546_v23 = vmax.f32 %v542_v19, %v1022_v20 }
 0x2b9   :  { %v549_v25 = vmax.f32 %v545_v22, %v546_v23 }
 0x2bd   :  { %v484_v29 = vpop.trf.xlu0 }
 0x2be   :  { %v535_v36 = vsel %vm519_vm15, -1e+11, %v484_v29 }
 0x2bf   :  { %v547_v41 = vmax.f32 %v543_v37, %v535_v36 }
 0x2c5   :  { %v485_v39 = vpop.trf.xlu0 }
 0x2c6   :  { %v536_v40 = vsel %vm520_vm0, -1e+11, %v485_v39 }
 0x2c7   :  { %v548_v42 = vmax.f32 %v544_v38, %v536_v40 }
 0x2c9   :  { %v550_v43 = vmax.f32 %v547_v41, %v548_v42 }
 0x2cb   :  { %v551_v44 = vmax.f32 %v549_v25, %v550_v43 }
 0x2cd   :  { %v552_v45 = vrot.slane %v551_v44, 4 }
 0x2cf   :  { %v553_v46 = vmax.f32 %v551_v44, %v552_v45 }
 0x2d1   :  { %v554_v47 = vrot.slane %v553_v46, 2 }
 0x2d3   :  { %v555_v52 = vmax.f32 %v553_v46, %v554_v47 }
 0x2d5   :  { %v556_v56 = vrot.slane %v555_v52, 1 }
 0x2d7   :  { %v557_v49 = vmax.f32 %v555_v52, %v556_v56 }
 0x2d9   :  { %vm558_vm1 = vcmp.eq.f32.partialorder %v956_v53, %v557_v49  ;;  %vm559_vm2 = vcmp.eq.f32.partialorder %v972_v59, %v557_v49  ;;  %vm560_vm3 = vcmp.eq.f32.partialorder %v988_v1, %v557_v49  ;;  %vm561_vm4 = vcmp.eq.f32.partialorder %v524_v32, %v557_v49 }
 0x2da   :  { %vm562_vm5 = vcmp.eq.f32.partialorder %v958_v54, %v557_v49  ;;  %vm563_vm6 = vcmp.eq.f32.partialorder %v974_v60, %v557_v49  ;;  %vm564_vm7 = vcmp.eq.f32.partialorder %v990_v2, %v557_v49  ;;  %vm565_vm8 = vcmp.eq.f32.partialorder %v528_v31, %v557_v49 }
 0x2db   :  { %vm566_vm9 = vcmp.eq.f32.partialorder %v1012_v14, %v557_v49  ;;  %vm567_vm10 = vcmp.eq.f32.partialorder %v1014_v15, %v557_v49  ;;  %vm568_vm11 = vcmp.eq.f32.partialorder %v531_v33, %v557_v49  ;;  %vm569_vm12 = vcmp.eq.f32.partialorder %v532_v34, %v557_v49 }
 0x2dc   :  { %vm570_vm13 = vcmp.eq.f32.partialorder %v1018_v16, %v557_v49  ;;  %vm571_vm14 = vcmp.eq.f32.partialorder %v1022_v20, %v557_v49  ;;  %vm572_vm15 = vcmp.eq.f32.partialorder %v535_v36, %v557_v49  ;;  %vm573_vm0 = vcmp.eq.f32.partialorder %v536_v40, %v557_v49 }
 0x2dd   :  { %v574_v50 = vsel %vm558_vm1, %v942_v48, 128  ;;  %v575_v58 = vsel %vm559_vm2, %v961_v55, 128  ;;  %v576_v62 = vsel %vm560_vm3, %v977_v61, 128  ;;  %v577_v0 = vsel %vm561_vm4, %v490_v26, 128 }
 0x2de   :  { %v578_v3 = vsel %vm562_vm5, %v950_v51, 128  ;;  %v579_v4 = vsel %vm563_vm6, %v966_v57, 128  ;;  %v580_v48 = vsel %vm564_vm7, %v982_v63, 128  ;;  %v581_v53 = vsel %vm565_vm8, %v494_v24, 128 }
 0x2df   :  { %v582_v55 = vsel %vm566_vm9, %v995_v9, 128  ;;  %v583_v59 = vsel %vm567_vm10, %v998_v10, 128  ;;  %v584_v51 = vsel %vm568_vm11, %v497_v27, 128  ;;  %v585_v54 = vsel %vm569_vm12, %v498_v28, 128 }
 0x2e0   :  { %v586_v57 = vsel %vm570_vm13, %v1001_v12, 128  ;;  %v587_v60 = vsel %vm571_vm14, %v1008_v13, 128  ;;  %v588_v61 = vsel %vm572_vm15, %v501_v18, 128  ;;  %v589_v63 = vsel %vm573_vm0, %v502_v30, 128 }
 0x2e1   :  { %vm590_vm1 = vcmp.lt.s32.totalorder %v574_v50, %v578_v3  ;;  %vm592_vm2 = vcmp.lt.s32.totalorder %v575_v58, %v579_v4  ;;  %vm594_vm3 = vcmp.lt.s32.totalorder %v576_v62, %v580_v48  ;;  %vm596_vm4 = vcmp.lt.s32.totalorder %v577_v0, %v581_v53 }
 0x2e2   :  { %v591_v1 = vsel %vm590_vm1, %v574_v50, %v578_v3  ;;  %v593_v2 = vsel %vm592_vm2, %v575_v58, %v579_v4  ;;  %v595_v5 = vsel %vm594_vm3, %v576_v62, %v580_v48  ;;  %v597_v6 = vsel %vm596_vm4, %v577_v0, %v581_v53 }
 0x2e3   :  { %vm598_vm5 = vcmp.lt.s32.totalorder %v591_v1, %v582_v55  ;;  %vm600_vm6 = vcmp.lt.s32.totalorder %v593_v2, %v583_v59  ;;  %vm602_vm7 = vcmp.lt.s32.totalorder %v595_v5, %v584_v51  ;;  %vm604_vm8 = vcmp.lt.s32.totalorder %v597_v6, %v585_v54 }
 0x2e4   :  { %v599_v7 = vsel %vm598_vm5, %v591_v1, %v582_v55  ;;  %v601_v8 = vsel %vm600_vm6, %v593_v2, %v583_v59  ;;  %v603_v9 = vsel %vm602_vm7, %v595_v5, %v584_v51  ;;  %v605_v10 = vsel %vm604_vm8, %v597_v6, %v585_v54 }
 0x2e5   :  { %vm606_vm9 = vcmp.lt.s32.totalorder %v599_v7, %v586_v57  ;;  %vm608_vm10 = vcmp.lt.s32.totalorder %v601_v8, %v587_v60  ;;  %vm610_vm11 = vcmp.lt.s32.totalorder %v603_v9, %v588_v61  ;;  %vm612_vm12 = vcmp.lt.s32.totalorder %v605_v10, %v589_v63 }
 0x2e6   :  { %v607_v11 = vsel %vm606_vm9, %v599_v7, %v586_v57  ;;  %v609_v12 = vsel %vm608_vm10, %v601_v8, %v587_v60  ;;  %v611_v13 = vsel %vm610_vm11, %v603_v9, %v588_v61  ;;  %v613_v14 = vsel %vm612_vm12, %v605_v10, %v589_v63 }
 0x2e7   :  { %vm614_vm13 = vcmp.lt.s32.totalorder %v607_v11, %v609_v12  ;;  %vm616_vm14 = vcmp.lt.s32.totalorder %v611_v13, %v613_v14 }
 0x2e8   :  { %v615_v15 = vsel %vm614_vm13, %v607_v11, %v609_v12  ;;  %v617_v16 = vsel %vm616_vm14, %v611_v13, %v613_v14 }
 0x2e9   :  { %vm618_vm15 = vcmp.lt.s32.totalorder %v615_v15, %v617_v16 }
 0x2ea   :  { %v619_v17 = vsel %vm618_vm15, %v615_v15, %v617_v16 }
 0x2eb   :  { %v620_v19 = vrot.slane %v619_v17, 4 }
 0x2ed   :  { %vm621_vm0 = vcmp.lt.s32.totalorder %v619_v17, %v620_v19 }
 0x2ee   :  { %v622_v21 = vsel %vm621_vm0, %v619_v17, %v620_v19 }
 0x2ef   :  { %v623_v20 = vrot.slane %v622_v21, 2 }
 0x2f1   :  { %vm624_vm1 = vcmp.lt.s32.totalorder %v622_v21, %v623_v20 }
 0x2f2   :  { %v625_v22 = vsel %vm624_vm1, %v622_v21, %v623_v20 }
 0x2f3   :  { %v626_v23 = vrot.slane %v625_v22, 1 }
 0x2f5   :  { %vm627_vm2 = vcmp.lt.s32.totalorder %v625_v22, %v626_v23 }
 0x2f6   :  { %v628_v24 = vsel %vm627_vm2, %v625_v22, %v626_v23 }
 0x2f7   :  { %629 = vst [vmem:[%s1095_s8] sm:$0x1] %v628_v24 }

</bundles_post_ra>
